<compile_context>
chip_gen: v5e
topology: v5e:2x2
jax: 0.10.0
libtpu: 0.0.40
codegen_flags: <defaults>
</compile_context>

<pallas_src>
import jax
import jax.numpy as jnp
from jax.experimental import pallas as pl
from jax.experimental.pallas import tpu as pltpu


# ----------------------------------------------------------------------------
# Fused Pallas kernel: num_layers LSTM layers (wavefront) + final Linear
# ----------------------------------------------------------------------------
def make_fused_lstm_kernel(num_layers, hidden_size, seq_len, batch_size):
    H, T, B = hidden_size, seq_len, batch_size

    def kernel(x_ref, h0_ref, c0_ref, *rest):
        # rest = wih_0, whh_0, b_0, ..., wih_{L-1}, whh_{L-1}, b_{L-1},
        #        lin_w, lin_b, out_ref
        layer_refs = rest[:3 * num_layers]
        lin_w_ref, lin_b_ref, out_ref = rest[3 * num_layers:]

        wih = [layer_refs[3 * l][...] for l in range(num_layers)]       # (F,4H) bf16
        whh = [layer_refs[3 * l + 1][...] for l in range(num_layers)]   # (H,4H) bf16
        bias = [layer_refs[3 * l + 2][...] for l in range(num_layers)]  # (1,4H) f32

        # -------- preamble, OFF the recurrent critical path ----------------
        x = x_ref[...]                                         # (B, T, I) f32
        # Time-major once (one XLU shuffle), so every per-step read of gx0 is a
        # contiguous static sublane slice.
        x_tm = jnp.transpose(x, (1, 0, 2)).reshape(T * B, -1)  # (T*B, I)
        gx0 = jnp.dot(x_tm.astype(jnp.bfloat16), wih[0],
                      preferred_element_type=jnp.float32) + bias[0]      # (T*B, 4H)

        h = [h0_ref[l] for l in range(num_layers)]             # (B, H) f32 each
        c = [c0_ref[l] for l in range(num_layers)]

        def cell(gates, c_prev):
            # Two full-width EUP passes over (B, 4H) instead of four 32-lane ones.
            sg = jax.nn.sigmoid(gates)
            tg = jnp.tanh(gates)
            i_g = sg[:, 0 * H:1 * H]        # PyTorch gate order: i, f, g, o
            f_g = sg[:, 1 * H:2 * H]
            g_g = tg[:, 2 * H:3 * H]
            o_g = sg[:, 3 * H:4 * H]
            c_new = f_g * c_prev + i_g * g_g
            h_new = o_g * jnp.tanh(c_new)
            return h_new, c_new

        # -------- wavefront over (layer, timestep) diagonals ----------------
        # Layer l's step t depends only on (l, t-1) and (l-1, t), both produced
        # on diagonal d-1 = l + t - 1.  Layers are visited in REVERSE order
        # within a diagonal so layer l reads h[l-1] before layer l-1 overwrites
        # it with its step-d value.  T and L are static -> fully unrolled.
        for d in range(T + num_layers - 1):
            for l in reversed(range(num_layers)):
                t = d - l
                if t < 0 or t >= T:
                    continue
                if l == 0:
                    gx_t = gx0[t * B:(t + 1) * B, :]           # contiguous rows
                else:
                    # Per-step input projection for upper layers: overlaps the
                    # lower layer's chain instead of waiting for its full seq.
                    gx_t = jnp.dot(h[l - 1].astype(jnp.bfloat16), wih[l],
                                   preferred_element_type=jnp.float32) + bias[l]
                gates = gx_t + jnp.dot(h[l].astype(jnp.bfloat16), whh[l],
                                       preferred_element_type=jnp.float32)
                h[l], c[l] = cell(gates, c[l])

        # pred = Linear(output)[:, -1, :]  ==  Linear(h_T of last layer)
        pred = jnp.dot(h[-1].astype(jnp.bfloat16), lin_w_ref[...],
                       preferred_element_type=jnp.float32) + lin_b_ref[...]
        out_ref[...] = pred.astype(out_ref.dtype)

    return kernel


def lstm_model_forward(params, input_seq, h0, c0):
    """input_seq: (B, T, input_size) batch_first, like nn.LSTM(batch_first=True).
    h0, c0: (num_layers, B, H) initial states.  Returns pred (B, output_size)."""
    B, T, _ = input_seq.shape
    L, _, H = h0.shape
    O = params["linear_w_t"].shape[-1]

    args = [input_seq, h0, c0]
    for lp in params["layers"]:
        args += [lp["wih_t"], lp["whh_t"], lp["b"]]
    args += [params["linear_w_t"], params["linear_b"]]

    kernel = make_fused_lstm_kernel(L, H, T, B)
    # No grid: default BlockSpecs place every (tiny) operand fully in VMEM with
    # one DMA in and one (B, O) DMA out.  vmem_limit guard keeps a scaled-up
    # config within v7x's 64 MiB VMEM.
    return pl.pallas_call(
        kernel,
        out_shape=jax.ShapeDtypeStruct((B, O), jnp.float32),
        compiler_params=pltpu.CompilerParams(vmem_limit_bytes=32 * 1024 * 1024),
    )(*args)


# ----------------------------------------------------------------------------
# Pure-JAX reference (same bf16-matmul / f32-accumulate strategy, sequential
# layer-by-layer schedule) for correctness checking
# ----------------------------------------------------------------------------
def lstm_model_forward_ref(params, input_seq, h0, c0):
    x = input_seq
    B, T, _ = x.shape
    H = h0.shape[-1]
    seq = x
    for l, lp in enumerate(params["layers"]):
        wih, whh, b = lp["wih_t"], lp["whh_t"], lp["b"]
        gx = (jnp.dot(seq.reshape(B * T, -1).astype(jnp.bfloat16), wih,
                      preferred_element_type=jnp.float32) + b).reshape(B, T, 4 * H)
        h, c = h0[l], c0[l]
        hs = []
        for t in range(T):
            gates = gx[:, t, :] + jnp.dot(h.astype(jnp.bfloat16), whh,
                                          preferred_element_type=jnp.float32)
            i_g = jax.nn.sigmoid(gates[:, 0 * H:1 * H])
            f_g = jax.nn.sigmoid(gates[:, 1 * H:2 * H])
            g_g = jnp.tanh(gates[:, 2 * H:3 * H])
            o_g = jax.nn.sigmoid(gates[:, 3 * H:4 * H])
            c = f_g * c + i_g * g_g
            h = o_g * jnp.tanh(c)
            hs.append(h)
        seq = jnp.stack(hs, axis=1)
    pred = jnp.dot(seq[:, -1, :].astype(jnp.bfloat16), params["linear_w_t"],
                   preferred_element_type=jnp.float32) + params["linear_b"]
    return pred


# ----------------------------------------------------------------------------
# Parameter construction (mimics nn.LSTM / nn.Linear shapes & init ranges)
# ----------------------------------------------------------------------------
def init_params(key, input_size, hidden_size, num_layers, output_size):
    params = {"layers": []}
    k = 1.0 / jnp.sqrt(hidden_size)
    for layer in range(num_layers):
        in_sz = input_size if layer == 0 else hidden_size
        key, k1, k2, k3, k4 = jax.random.split(key, 5)
        w_ih = jax.random.uniform(k1, (4 * hidden_size, in_sz), jnp.float32, -k, k)
        w_hh = jax.random.uniform(k2, (4 * hidden_size, hidden_size), jnp.float32, -k, k)
        b_ih = jax.random.uniform(k3, (4 * hidden_size,), jnp.float32, -k, k)
        b_hh = jax.random.uniform(k4, (4 * hidden_size,), jnp.float32, -k, k)
        params["layers"].append({
            "wih_t": w_ih.T.astype(jnp.bfloat16),            # (I, 4H) bf16 MXU operand
            "whh_t": w_hh.T.astype(jnp.bfloat16),            # (H, 4H) bf16 MXU operand
            "b": (b_ih + b_hh).reshape(1, 4 * hidden_size),  # (1, 4H) f32
        })
    key, k1, k2 = jax.random.split(key, 3)
    w_lin = jax.random.uniform(k1, (output_size, hidden_size), jnp.float32, -k, k)
    b_lin = jax.random.uniform(k2, (output_size,), jnp.float32, -k, k)
    params["linear_w_t"] = w_lin.T.astype(jnp.bfloat16)      # (H, O) bf16
    params["linear_b"] = b_lin.reshape(1, output_size)       # (1, O) f32
    return params


if __name__ == "__main__":
    input_size = 16
    hidden_size = 32
    num_layers = 2
    output_size = 4
    batch_size = 2
    seq_len = 8

    key = jax.random.PRNGKey(0)
    key, kp, kx, kh, kc = jax.random.split(key, 5)

    params = init_params(kp, input_size, hidden_size, num_layers, output_size)
    input_seq = jax.random.normal(kx, (batch_size, seq_len, input_size), jnp.float32)
    # The PyTorch forward draws fresh random h_0 / c_0 each call; here they are
    # drawn deterministically from PRNGKey(0)-derived keys.
    h0 = jax.random.normal(kh, (num_layers, batch_size, hidden_size), jnp.float32)
    c0 = jax.random.normal(kc, (num_layers, batch_size, hidden_size), jnp.float32)

    pred = lstm_model_forward(params, input_seq, h0, c0)
    pred = jax.block_until_ready(pred)

    ref = jax.block_until_ready(lstm_model_forward_ref(params, input_seq, h0, c0))

    assert pred.shape == (batch_size, output_size)
    assert jnp.all(jnp.isfinite(pred))
    assert jnp.allclose(pred, ref, atol=5e-3, rtol=5e-3), (
        f"max abs diff {jnp.max(jnp.abs(pred - ref))}")
    print("KERNEL_OK")
</pallas_src>

<mosaic_0001>
module attributes {stable_mosaic.version = 11 : i64} {
  func.func @kernel(%arg0: memref<2x8x16xf32, #tpu.memory_space<vmem>>, %arg1: memref<2x2x32xf32, #tpu.memory_space<vmem>>, %arg2: memref<2x2x32xf32, #tpu.memory_space<vmem>>, %arg3: memref<16x128xbf16, #tpu.memory_space<vmem>>, %arg4: memref<32x128xbf16, #tpu.memory_space<vmem>>, %arg5: memref<1x128xf32, #tpu.memory_space<vmem>>, %arg6: memref<32x128xbf16, #tpu.memory_space<vmem>>, %arg7: memref<32x128xbf16, #tpu.memory_space<vmem>>, %arg8: memref<1x128xf32, #tpu.memory_space<vmem>>, %arg9: memref<32x4xbf16, #tpu.memory_space<vmem>>, %arg10: memref<1x4xf32, #tpu.memory_space<vmem>>, %arg11: memref<2x4xf32, #tpu.memory_space<vmem>>) attributes {dimension_semantics = [], scalar_prefetch = 0 : i64, scratch_operands = 0 : i64, tpu.core_type = #tpu.core_type<tc>} {
    %c0 = arith.constant 0 : index
    %c0_0 = arith.constant 0 : index
    %0 = vector.load %arg3[%c0, %c0_0] : memref<16x128xbf16, #tpu.memory_space<vmem>>, vector<16x128xbf16>
    %c0_1 = arith.constant 0 : index
    %c0_2 = arith.constant 0 : index
    %1 = vector.load %arg6[%c0_1, %c0_2] : memref<32x128xbf16, #tpu.memory_space<vmem>>, vector<32x128xbf16>
    %c0_3 = arith.constant 0 : index
    %c0_4 = arith.constant 0 : index
    %2 = vector.load %arg4[%c0_3, %c0_4] : memref<32x128xbf16, #tpu.memory_space<vmem>>, vector<32x128xbf16>
    %c0_5 = arith.constant 0 : index
    %c0_6 = arith.constant 0 : index
    %3 = vector.load %arg7[%c0_5, %c0_6] : memref<32x128xbf16, #tpu.memory_space<vmem>>, vector<32x128xbf16>
    %c0_7 = arith.constant 0 : index
    %c0_8 = arith.constant 0 : index
    %4 = vector.load %arg5[%c0_7, %c0_8] : memref<1x128xf32, #tpu.memory_space<vmem>>, vector<1x128xf32>
    %c0_9 = arith.constant 0 : index
    %c0_10 = arith.constant 0 : index
    %5 = vector.load %arg8[%c0_9, %c0_10] : memref<1x128xf32, #tpu.memory_space<vmem>>, vector<1x128xf32>
    %c0_11 = arith.constant 0 : index
    %c0_12 = arith.constant 0 : index
    %c0_13 = arith.constant 0 : index
    %6 = vector.load %arg0[%c0_11, %c0_12, %c0_13] : memref<2x8x16xf32, #tpu.memory_space<vmem>>, vector<2x8x16xf32>
    %7 = tpu.transpose %6, [1, 0, 2] : vector<2x8x16xf32> -> vector<8x2x16xf32>
    %8 = vector.shape_cast %7 : vector<8x2x16xf32> to vector<16x16xf32>
    %9 = arith.truncf %8 : vector<16x16xf32> to vector<16x16xbf16>
    %cst = arith.constant dense<0.000000e+00> : vector<16x128xf32>
    %10 = tpu.matmul %9, %0, %cst {dimension_numbers = #tpu.dot_dimension_numbers<[1], [0], [0], [1], [0, 0, 1, 1], [], []>} : vector<16x16xbf16>, vector<16x128xbf16>, vector<16x128xf32> -> vector<16x128xf32>
    %11 = vector.broadcast %4 : vector<1x128xf32> to vector<16x128xf32>
    %12 = arith.addf %10, %11 : vector<16x128xf32>
    %c0_14 = arith.constant 0 : index
    %c0_15 = arith.constant 0 : index
    %c0_16 = arith.constant 0 : index
    %13 = vector.load %arg1[%c0_14, %c0_15, %c0_16] : memref<2x2x32xf32, #tpu.memory_space<vmem>>, vector<1x2x32xf32>
    %14 = vector.shape_cast %13 : vector<1x2x32xf32> to vector<2x32xf32>
    %c1 = arith.constant 1 : index
    %c0_17 = arith.constant 0 : index
    %c0_18 = arith.constant 0 : index
    %15 = vector.load %arg1[%c1, %c0_17, %c0_18] : memref<2x2x32xf32, #tpu.memory_space<vmem>>, vector<1x2x32xf32>
    %16 = vector.shape_cast %15 : vector<1x2x32xf32> to vector<2x32xf32>
    %c0_19 = arith.constant 0 : index
    %c0_20 = arith.constant 0 : index
    %c0_21 = arith.constant 0 : index
    %17 = vector.load %arg2[%c0_19, %c0_20, %c0_21] : memref<2x2x32xf32, #tpu.memory_space<vmem>>, vector<1x2x32xf32>
    %18 = vector.shape_cast %17 : vector<1x2x32xf32> to vector<2x32xf32>
    %c1_22 = arith.constant 1 : index
    %c0_23 = arith.constant 0 : index
    %c0_24 = arith.constant 0 : index
    %19 = vector.load %arg2[%c1_22, %c0_23, %c0_24] : memref<2x2x32xf32, #tpu.memory_space<vmem>>, vector<1x2x32xf32>
    %20 = vector.shape_cast %19 : vector<1x2x32xf32> to vector<2x32xf32>
    %21 = vector.extract_strided_slice %12 {offsets = [0, 0], sizes = [2, 128], strides = [1, 1]} : vector<16x128xf32> to vector<2x128xf32>
    %22 = arith.truncf %14 : vector<2x32xf32> to vector<2x32xbf16>
    %cst_25 = arith.constant dense<0.000000e+00> : vector<2x128xf32>
    %23 = tpu.matmul %22, %2, %cst_25 {dimension_numbers = #tpu.dot_dimension_numbers<[1], [0], [0], [1], [0, 0, 1, 1], [], []>} : vector<2x32xbf16>, vector<32x128xbf16>, vector<2x128xf32> -> vector<2x128xf32>
    %24 = arith.addf %21, %23 : vector<2x128xf32>
    %25 = arith.negf %24 : vector<2x128xf32>
    %26 = math.exp %25 : vector<2x128xf32>
    %cst_26 = arith.constant 1.000000e+00 : f32
    %27 = vector.broadcast %cst_26 : f32 to vector<2x128xf32>
    %28 = arith.addf %27, %26 : vector<2x128xf32>
    %29 = arith.divf %27, %28 : vector<2x128xf32>
    %30 = math.tanh %24 : vector<2x128xf32>
    %31 = vector.extract_strided_slice %29 {offsets = [0, 0], sizes = [2, 32], strides = [1, 1]} : vector<2x128xf32> to vector<2x32xf32>
    %32 = vector.extract_strided_slice %29 {offsets = [0, 32], sizes = [2, 32], strides = [1, 1]} : vector<2x128xf32> to vector<2x32xf32>
    %33 = vector.extract_strided_slice %30 {offsets = [0, 64], sizes = [2, 32], strides = [1, 1]} : vector<2x128xf32> to vector<2x32xf32>
    %34 = vector.extract_strided_slice %29 {offsets = [0, 96], sizes = [2, 32], strides = [1, 1]} : vector<2x128xf32> to vector<2x32xf32>
    %35 = arith.mulf %32, %18 : vector<2x32xf32>
    %36 = arith.mulf %31, %33 : vector<2x32xf32>
    %37 = arith.addf %35, %36 : vector<2x32xf32>
    %38 = math.tanh %37 : vector<2x32xf32>
    %39 = arith.mulf %34, %38 : vector<2x32xf32>
    %40 = arith.truncf %39 : vector<2x32xf32> to vector<2x32xbf16>
    %cst_27 = arith.constant dense<0.000000e+00> : vector<2x128xf32>
    %41 = tpu.matmul %40, %1, %cst_27 {dimension_numbers = #tpu.dot_dimension_numbers<[1], [0], [0], [1], [0, 0, 1, 1], [], []>} : vector<2x32xbf16>, vector<32x128xbf16>, vector<2x128xf32> -> vector<2x128xf32>
    %42 = vector.broadcast %5 : vector<1x128xf32> to vector<2x128xf32>
    %43 = arith.addf %41, %42 : vector<2x128xf32>
    %44 = arith.truncf %16 : vector<2x32xf32> to vector<2x32xbf16>
    %cst_28 = arith.constant dense<0.000000e+00> : vector<2x128xf32>
    %45 = tpu.matmul %44, %3, %cst_28 {dimension_numbers = #tpu.dot_dimension_numbers<[1], [0], [0], [1], [0, 0, 1, 1], [], []>} : vector<2x32xbf16>, vector<32x128xbf16>, vector<2x128xf32> -> vector<2x128xf32>
    %46 = arith.addf %43, %45 : vector<2x128xf32>
    %47 = arith.negf %46 : vector<2x128xf32>
    %48 = math.exp %47 : vector<2x128xf32>
    %cst_29 = arith.constant 1.000000e+00 : f32
    %49 = vector.broadcast %cst_29 : f32 to vector<2x128xf32>
    %50 = arith.addf %49, %48 : vector<2x128xf32>
    %51 = arith.divf %49, %50 : vector<2x128xf32>
    %52 = math.tanh %46 : vector<2x128xf32>
    %53 = vector.extract_strided_slice %51 {offsets = [0, 0], sizes = [2, 32], strides = [1, 1]} : vector<2x128xf32> to vector<2x32xf32>
    %54 = vector.extract_strided_slice %51 {offsets = [0, 32], sizes = [2, 32], strides = [1, 1]} : vector<2x128xf32> to vector<2x32xf32>
    %55 = vector.extract_strided_slice %52 {offsets = [0, 64], sizes = [2, 32], strides = [1, 1]} : vector<2x128xf32> to vector<2x32xf32>
    %56 = vector.extract_strided_slice %51 {offsets = [0, 96], sizes = [2, 32], strides = [1, 1]} : vector<2x128xf32> to vector<2x32xf32>
    %57 = arith.mulf %54, %20 : vector<2x32xf32>
    %58 = arith.mulf %53, %55 : vector<2x32xf32>
    %59 = arith.addf %57, %58 : vector<2x32xf32>
    %60 = math.tanh %59 : vector<2x32xf32>
    %61 = arith.mulf %56, %60 : vector<2x32xf32>
    %62 = vector.extract_strided_slice %12 {offsets = [2, 0], sizes = [2, 128], strides = [1, 1]} : vector<16x128xf32> to vector<2x128xf32>
    %63 = arith.truncf %39 : vector<2x32xf32> to vector<2x32xbf16>
    %cst_30 = arith.constant dense<0.000000e+00> : vector<2x128xf32>
    %64 = tpu.matmul %63, %2, %cst_30 {dimension_numbers = #tpu.dot_dimension_numbers<[1], [0], [0], [1], [0, 0, 1, 1], [], []>} : vector<2x32xbf16>, vector<32x128xbf16>, vector<2x128xf32> -> vector<2x128xf32>
    %65 = arith.addf %62, %64 : vector<2x128xf32>
    %66 = arith.negf %65 : vector<2x128xf32>
    %67 = math.exp %66 : vector<2x128xf32>
    %cst_31 = arith.constant 1.000000e+00 : f32
    %68 = vector.broadcast %cst_31 : f32 to vector<2x128xf32>
    %69 = arith.addf %68, %67 : vector<2x128xf32>
    %70 = arith.divf %68, %69 : vector<2x128xf32>
    %71 = math.tanh %65 : vector<2x128xf32>
    %72 = vector.extract_strided_slice %70 {offsets = [0, 0], sizes = [2, 32], strides = [1, 1]} : vector<2x128xf32> to vector<2x32xf32>
    %73 = vector.extract_strided_slice %70 {offsets = [0, 32], sizes = [2, 32], strides = [1, 1]} : vector<2x128xf32> to vector<2x32xf32>
    %74 = vector.extract_strided_slice %71 {offsets = [0, 64], sizes = [2, 32], strides = [1, 1]} : vector<2x128xf32> to vector<2x32xf32>
    %75 = vector.extract_strided_slice %70 {offsets = [0, 96], sizes = [2, 32], strides = [1, 1]} : vector<2x128xf32> to vector<2x32xf32>
    %76 = arith.mulf %73, %37 : vector<2x32xf32>
    %77 = arith.mulf %72, %74 : vector<2x32xf32>
    %78 = arith.addf %76, %77 : vector<2x32xf32>
    %79 = math.tanh %78 : vector<2x32xf32>
    %80 = arith.mulf %75, %79 : vector<2x32xf32>
    %81 = arith.truncf %80 : vector<2x32xf32> to vector<2x32xbf16>
    %cst_32 = arith.constant dense<0.000000e+00> : vector<2x128xf32>
    %82 = tpu.matmul %81, %1, %cst_32 {dimension_numbers = #tpu.dot_dimension_numbers<[1], [0], [0], [1], [0, 0, 1, 1], [], []>} : vector<2x32xbf16>, vector<32x128xbf16>, vector<2x128xf32> -> vector<2x128xf32>
    %83 = vector.broadcast %5 : vector<1x128xf32> to vector<2x128xf32>
    %84 = arith.addf %82, %83 : vector<2x128xf32>
    %85 = arith.truncf %61 : vector<2x32xf32> to vector<2x32xbf16>
    %cst_33 = arith.constant dense<0.000000e+00> : vector<2x128xf32>
    %86 = tpu.matmul %85, %3, %cst_33 {dimension_numbers = #tpu.dot_dimension_numbers<[1], [0], [0], [1], [0, 0, 1, 1], [], []>} : vector<2x32xbf16>, vector<32x128xbf16>, vector<2x128xf32> -> vector<2x128xf32>
    %87 = arith.addf %84, %86 : vector<2x128xf32>
    %88 = arith.negf %87 : vector<2x128xf32>
    %89 = math.exp %88 : vector<2x128xf32>
    %cst_34 = arith.constant 1.000000e+00 : f32
    %90 = vector.broadcast %cst_34 : f32 to vector<2x128xf32>
    %91 = arith.addf %90, %89 : vector<2x128xf32>
    %92 = arith.divf %90, %91 : vector<2x128xf32>
    %93 = math.tanh %87 : vector<2x128xf32>
    %94 = vector.extract_strided_slice %92 {offsets = [0, 0], sizes = [2, 32], strides = [1, 1]} : vector<2x128xf32> to vector<2x32xf32>
    %95 = vector.extract_strided_slice %92 {offsets = [0, 32], sizes = [2, 32], strides = [1, 1]} : vector<2x128xf32> to vector<2x32xf32>
    %96 = vector.extract_strided_slice %93 {offsets = [0, 64], sizes = [2, 32], strides = [1, 1]} : vector<2x128xf32> to vector<2x32xf32>
    %97 = vector.extract_strided_slice %92 {offsets = [0, 96], sizes = [2, 32], strides = [1, 1]} : vector<2x128xf32> to vector<2x32xf32>
    %98 = arith.mulf %95, %59 : vector<2x32xf32>
    %99 = arith.mulf %94, %96 : vector<2x32xf32>
    %100 = arith.addf %98, %99 : vector<2x32xf32>
    %101 = math.tanh %100 : vector<2x32xf32>
    %102 = arith.mulf %97, %101 : vector<2x32xf32>
    %103 = vector.extract_strided_slice %12 {offsets = [4, 0], sizes = [2, 128], strides = [1, 1]} : vector<16x128xf32> to vector<2x128xf32>
    %104 = arith.truncf %80 : vector<2x32xf32> to vector<2x32xbf16>
    %cst_35 = arith.constant dense<0.000000e+00> : vector<2x128xf32>
    %105 = tpu.matmul %104, %2, %cst_35 {dimension_numbers = #tpu.dot_dimension_numbers<[1], [0], [0], [1], [0, 0, 1, 1], [], []>} : vector<2x32xbf16>, vector<32x128xbf16>, vector<2x128xf32> -> vector<2x128xf32>
    %106 = arith.addf %103, %105 : vector<2x128xf32>
    %107 = arith.negf %106 : vector<2x128xf32>
    %108 = math.exp %107 : vector<2x128xf32>
    %cst_36 = arith.constant 1.000000e+00 : f32
    %109 = vector.broadcast %cst_36 : f32 to vector<2x128xf32>
    %110 = arith.addf %109, %108 : vector<2x128xf32>
    %111 = arith.divf %109, %110 : vector<2x128xf32>
    %112 = math.tanh %106 : vector<2x128xf32>
    %113 = vector.extract_strided_slice %111 {offsets = [0, 0], sizes = [2, 32], strides = [1, 1]} : vector<2x128xf32> to vector<2x32xf32>
    %114 = vector.extract_strided_slice %111 {offsets = [0, 32], sizes = [2, 32], strides = [1, 1]} : vector<2x128xf32> to vector<2x32xf32>
    %115 = vector.extract_strided_slice %112 {offsets = [0, 64], sizes = [2, 32], strides = [1, 1]} : vector<2x128xf32> to vector<2x32xf32>
    %116 = vector.extract_strided_slice %111 {offsets = [0, 96], sizes = [2, 32], strides = [1, 1]} : vector<2x128xf32> to vector<2x32xf32>
    %117 = arith.mulf %114, %78 : vector<2x32xf32>
    %118 = arith.mulf %113, %115 : vector<2x32xf32>
    %119 = arith.addf %117, %118 : vector<2x32xf32>
    %120 = math.tanh %119 : vector<2x32xf32>
    %121 = arith.mulf %116, %120 : vector<2x32xf32>
    %122 = arith.truncf %121 : vector<2x32xf32> to vector<2x32xbf16>
    %cst_37 = arith.constant dense<0.000000e+00> : vector<2x128xf32>
    %123 = tpu.matmul %122, %1, %cst_37 {dimension_numbers = #tpu.dot_dimension_numbers<[1], [0], [0], [1], [0, 0, 1, 1], [], []>} : vector<2x32xbf16>, vector<32x128xbf16>, vector<2x128xf32> -> vector<2x128xf32>
    %124 = vector.broadcast %5 : vector<1x128xf32> to vector<2x128xf32>
    %125 = arith.addf %123, %124 : vector<2x128xf32>
    %126 = arith.truncf %102 : vector<2x32xf32> to vector<2x32xbf16>
    %cst_38 = arith.constant dense<0.000000e+00> : vector<2x128xf32>
    %127 = tpu.matmul %126, %3, %cst_38 {dimension_numbers = #tpu.dot_dimension_numbers<[1], [0], [0], [1], [0, 0, 1, 1], [], []>} : vector<2x32xbf16>, vector<32x128xbf16>, vector<2x128xf32> -> vector<2x128xf32>
    %128 = arith.addf %125, %127 : vector<2x128xf32>
    %129 = arith.negf %128 : vector<2x128xf32>
    %130 = math.exp %129 : vector<2x128xf32>
    %cst_39 = arith.constant 1.000000e+00 : f32
    %131 = vector.broadcast %cst_39 : f32 to vector<2x128xf32>
    %132 = arith.addf %131, %130 : vector<2x128xf32>
    %133 = arith.divf %131, %132 : vector<2x128xf32>
    %134 = math.tanh %128 : vector<2x128xf32>
    %135 = vector.extract_strided_slice %133 {offsets = [0, 0], sizes = [2, 32], strides = [1, 1]} : vector<2x128xf32> to vector<2x32xf32>
    %136 = vector.extract_strided_slice %133 {offsets = [0, 32], sizes = [2, 32], strides = [1, 1]} : vector<2x128xf32> to vector<2x32xf32>
    %137 = vector.extract_strided_slice %134 {offsets = [0, 64], sizes = [2, 32], strides = [1, 1]} : vector<2x128xf32> to vector<2x32xf32>
    %138 = vector.extract_strided_slice %133 {offsets = [0, 96], sizes = [2, 32], strides = [1, 1]} : vector<2x128xf32> to vector<2x32xf32>
    %139 = arith.mulf %136, %100 : vector<2x32xf32>
    %140 = arith.mulf %135, %137 : vector<2x32xf32>
    %141 = arith.addf %139, %140 : vector<2x32xf32>
    %142 = math.tanh %141 : vector<2x32xf32>
    %143 = arith.mulf %138, %142 : vector<2x32xf32>
    %144 = vector.extract_strided_slice %12 {offsets = [6, 0], sizes = [2, 128], strides = [1, 1]} : vector<16x128xf32> to vector<2x128xf32>
    %145 = arith.truncf %121 : vector<2x32xf32> to vector<2x32xbf16>
    %cst_40 = arith.constant dense<0.000000e+00> : vector<2x128xf32>
    %146 = tpu.matmul %145, %2, %cst_40 {dimension_numbers = #tpu.dot_dimension_numbers<[1], [0], [0], [1], [0, 0, 1, 1], [], []>} : vector<2x32xbf16>, vector<32x128xbf16>, vector<2x128xf32> -> vector<2x128xf32>
    %147 = arith.addf %144, %146 : vector<2x128xf32>
    %148 = arith.negf %147 : vector<2x128xf32>
    %149 = math.exp %148 : vector<2x128xf32>
    %cst_41 = arith.constant 1.000000e+00 : f32
    %150 = vector.broadcast %cst_41 : f32 to vector<2x128xf32>
    %151 = arith.addf %150, %149 : vector<2x128xf32>
    %152 = arith.divf %150, %151 : vector<2x128xf32>
    %153 = math.tanh %147 : vector<2x128xf32>
    %154 = vector.extract_strided_slice %152 {offsets = [0, 0], sizes = [2, 32], strides = [1, 1]} : vector<2x128xf32> to vector<2x32xf32>
    %155 = vector.extract_strided_slice %152 {offsets = [0, 32], sizes = [2, 32], strides = [1, 1]} : vector<2x128xf32> to vector<2x32xf32>
    %156 = vector.extract_strided_slice %153 {offsets = [0, 64], sizes = [2, 32], strides = [1, 1]} : vector<2x128xf32> to vector<2x32xf32>
    %157 = vector.extract_strided_slice %152 {offsets = [0, 96], sizes = [2, 32], strides = [1, 1]} : vector<2x128xf32> to vector<2x32xf32>
    %158 = arith.mulf %155, %119 : vector<2x32xf32>
    %159 = arith.mulf %154, %156 : vector<2x32xf32>
    %160 = arith.addf %158, %159 : vector<2x32xf32>
    %161 = math.tanh %160 : vector<2x32xf32>
    %162 = arith.mulf %157, %161 : vector<2x32xf32>
    %163 = arith.truncf %162 : vector<2x32xf32> to vector<2x32xbf16>
    %cst_42 = arith.constant dense<0.000000e+00> : vector<2x128xf32>
    %164 = tpu.matmul %163, %1, %cst_42 {dimension_numbers = #tpu.dot_dimension_numbers<[1], [0], [0], [1], [0, 0, 1, 1], [], []>} : vector<2x32xbf16>, vector<32x128xbf16>, vector<2x128xf32> -> vector<2x128xf32>
    %165 = vector.broadcast %5 : vector<1x128xf32> to vector<2x128xf32>
    %166 = arith.addf %164, %165 : vector<2x128xf32>
    %167 = arith.truncf %143 : vector<2x32xf32> to vector<2x32xbf16>
    %cst_43 = arith.constant dense<0.000000e+00> : vector<2x128xf32>
    %168 = tpu.matmul %167, %3, %cst_43 {dimension_numbers = #tpu.dot_dimension_numbers<[1], [0], [0], [1], [0, 0, 1, 1], [], []>} : vector<2x32xbf16>, vector<32x128xbf16>, vector<2x128xf32> -> vector<2x128xf32>
    %169 = arith.addf %166, %168 : vector<2x128xf32>
    %170 = arith.negf %169 : vector<2x128xf32>
    %171 = math.exp %170 : vector<2x128xf32>
    %cst_44 = arith.constant 1.000000e+00 : f32
    %172 = vector.broadcast %cst_44 : f32 to vector<2x128xf32>
    %173 = arith.addf %172, %171 : vector<2x128xf32>
    %174 = arith.divf %172, %173 : vector<2x128xf32>
    %175 = math.tanh %169 : vector<2x128xf32>
    %176 = vector.extract_strided_slice %174 {offsets = [0, 0], sizes = [2, 32], strides = [1, 1]} : vector<2x128xf32> to vector<2x32xf32>
    %177 = vector.extract_strided_slice %174 {offsets = [0, 32], sizes = [2, 32], strides = [1, 1]} : vector<2x128xf32> to vector<2x32xf32>
    %178 = vector.extract_strided_slice %175 {offsets = [0, 64], sizes = [2, 32], strides = [1, 1]} : vector<2x128xf32> to vector<2x32xf32>
    %179 = vector.extract_strided_slice %174 {offsets = [0, 96], sizes = [2, 32], strides = [1, 1]} : vector<2x128xf32> to vector<2x32xf32>
    %180 = arith.mulf %177, %141 : vector<2x32xf32>
    %181 = arith.mulf %176, %178 : vector<2x32xf32>
    %182 = arith.addf %180, %181 : vector<2x32xf32>
    %183 = math.tanh %182 : vector<2x32xf32>
    %184 = arith.mulf %179, %183 : vector<2x32xf32>
    %185 = vector.extract_strided_slice %12 {offsets = [8, 0], sizes = [2, 128], strides = [1, 1]} : vector<16x128xf32> to vector<2x128xf32>
    %186 = arith.truncf %162 : vector<2x32xf32> to vector<2x32xbf16>
    %cst_45 = arith.constant dense<0.000000e+00> : vector<2x128xf32>
    %187 = tpu.matmul %186, %2, %cst_45 {dimension_numbers = #tpu.dot_dimension_numbers<[1], [0], [0], [1], [0, 0, 1, 1], [], []>} : vector<2x32xbf16>, vector<32x128xbf16>, vector<2x128xf32> -> vector<2x128xf32>
    %188 = arith.addf %185, %187 : vector<2x128xf32>
    %189 = arith.negf %188 : vector<2x128xf32>
    %190 = math.exp %189 : vector<2x128xf32>
    %cst_46 = arith.constant 1.000000e+00 : f32
    %191 = vector.broadcast %cst_46 : f32 to vector<2x128xf32>
    %192 = arith.addf %191, %190 : vector<2x128xf32>
    %193 = arith.divf %191, %192 : vector<2x128xf32>
    %194 = math.tanh %188 : vector<2x128xf32>
    %195 = vector.extract_strided_slice %193 {offsets = [0, 0], sizes = [2, 32], strides = [1, 1]} : vector<2x128xf32> to vector<2x32xf32>
    %196 = vector.extract_strided_slice %193 {offsets = [0, 32], sizes = [2, 32], strides = [1, 1]} : vector<2x128xf32> to vector<2x32xf32>
    %197 = vector.extract_strided_slice %194 {offsets = [0, 64], sizes = [2, 32], strides = [1, 1]} : vector<2x128xf32> to vector<2x32xf32>
    %198 = vector.extract_strided_slice %193 {offsets = [0, 96], sizes = [2, 32], strides = [1, 1]} : vector<2x128xf32> to vector<2x32xf32>
    %199 = arith.mulf %196, %160 : vector<2x32xf32>
    %200 = arith.mulf %195, %197 : vector<2x32xf32>
    %201 = arith.addf %199, %200 : vector<2x32xf32>
    %202 = math.tanh %201 : vector<2x32xf32>
    %203 = arith.mulf %198, %202 : vector<2x32xf32>
    %204 = arith.truncf %203 : vector<2x32xf32> to vector<2x32xbf16>
    %cst_47 = arith.constant dense<0.000000e+00> : vector<2x128xf32>
    %205 = tpu.matmul %204, %1, %cst_47 {dimension_numbers = #tpu.dot_dimension_numbers<[1], [0], [0], [1], [0, 0, 1, 1], [], []>} : vector<2x32xbf16>, vector<32x128xbf16>, vector<2x128xf32> -> vector<2x128xf32>
    %206 = vector.broadcast %5 : vector<1x128xf32> to vector<2x128xf32>
    %207 = arith.addf %205, %206 : vector<2x128xf32>
    %208 = arith.truncf %184 : vector<2x32xf32> to vector<2x32xbf16>
    %cst_48 = arith.constant dense<0.000000e+00> : vector<2x128xf32>
    %209 = tpu.matmul %208, %3, %cst_48 {dimension_numbers = #tpu.dot_dimension_numbers<[1], [0], [0], [1], [0, 0, 1, 1], [], []>} : vector<2x32xbf16>, vector<32x128xbf16>, vector<2x128xf32> -> vector<2x128xf32>
    %210 = arith.addf %207, %209 : vector<2x128xf32>
    %211 = arith.negf %210 : vector<2x128xf32>
    %212 = math.exp %211 : vector<2x128xf32>
    %cst_49 = arith.constant 1.000000e+00 : f32
    %213 = vector.broadcast %cst_49 : f32 to vector<2x128xf32>
    %214 = arith.addf %213, %212 : vector<2x128xf32>
    %215 = arith.divf %213, %214 : vector<2x128xf32>
    %216 = math.tanh %210 : vector<2x128xf32>
    %217 = vector.extract_strided_slice %215 {offsets = [0, 0], sizes = [2, 32], strides = [1, 1]} : vector<2x128xf32> to vector<2x32xf32>
    %218 = vector.extract_strided_slice %215 {offsets = [0, 32], sizes = [2, 32], strides = [1, 1]} : vector<2x128xf32> to vector<2x32xf32>
    %219 = vector.extract_strided_slice %216 {offsets = [0, 64], sizes = [2, 32], strides = [1, 1]} : vector<2x128xf32> to vector<2x32xf32>
    %220 = vector.extract_strided_slice %215 {offsets = [0, 96], sizes = [2, 32], strides = [1, 1]} : vector<2x128xf32> to vector<2x32xf32>
    %221 = arith.mulf %218, %182 : vector<2x32xf32>
    %222 = arith.mulf %217, %219 : vector<2x32xf32>
    %223 = arith.addf %221, %222 : vector<2x32xf32>
    %224 = math.tanh %223 : vector<2x32xf32>
    %225 = arith.mulf %220, %224 : vector<2x32xf32>
    %226 = vector.extract_strided_slice %12 {offsets = [10, 0], sizes = [2, 128], strides = [1, 1]} : vector<16x128xf32> to vector<2x128xf32>
    %227 = arith.truncf %203 : vector<2x32xf32> to vector<2x32xbf16>
    %cst_50 = arith.constant dense<0.000000e+00> : vector<2x128xf32>
    %228 = tpu.matmul %227, %2, %cst_50 {dimension_numbers = #tpu.dot_dimension_numbers<[1], [0], [0], [1], [0, 0, 1, 1], [], []>} : vector<2x32xbf16>, vector<32x128xbf16>, vector<2x128xf32> -> vector<2x128xf32>
    %229 = arith.addf %226, %228 : vector<2x128xf32>
    %230 = arith.negf %229 : vector<2x128xf32>
    %231 = math.exp %230 : vector<2x128xf32>
    %cst_51 = arith.constant 1.000000e+00 : f32
    %232 = vector.broadcast %cst_51 : f32 to vector<2x128xf32>
    %233 = arith.addf %232, %231 : vector<2x128xf32>
    %234 = arith.divf %232, %233 : vector<2x128xf32>
    %235 = math.tanh %229 : vector<2x128xf32>
    %236 = vector.extract_strided_slice %234 {offsets = [0, 0], sizes = [2, 32], strides = [1, 1]} : vector<2x128xf32> to vector<2x32xf32>
    %237 = vector.extract_strided_slice %234 {offsets = [0, 32], sizes = [2, 32], strides = [1, 1]} : vector<2x128xf32> to vector<2x32xf32>
    %238 = vector.extract_strided_slice %235 {offsets = [0, 64], sizes = [2, 32], strides = [1, 1]} : vector<2x128xf32> to vector<2x32xf32>
    %239 = vector.extract_strided_slice %234 {offsets = [0, 96], sizes = [2, 32], strides = [1, 1]} : vector<2x128xf32> to vector<2x32xf32>
    %240 = arith.mulf %237, %201 : vector<2x32xf32>
    %241 = arith.mulf %236, %238 : vector<2x32xf32>
    %242 = arith.addf %240, %241 : vector<2x32xf32>
    %243 = math.tanh %242 : vector<2x32xf32>
    %244 = arith.mulf %239, %243 : vector<2x32xf32>
    %245 = arith.truncf %244 : vector<2x32xf32> to vector<2x32xbf16>
    %cst_52 = arith.constant dense<0.000000e+00> : vector<2x128xf32>
    %246 = tpu.matmul %245, %1, %cst_52 {dimension_numbers = #tpu.dot_dimension_numbers<[1], [0], [0], [1], [0, 0, 1, 1], [], []>} : vector<2x32xbf16>, vector<32x128xbf16>, vector<2x128xf32> -> vector<2x128xf32>
    %247 = vector.broadcast %5 : vector<1x128xf32> to vector<2x128xf32>
    %248 = arith.addf %246, %247 : vector<2x128xf32>
    %249 = arith.truncf %225 : vector<2x32xf32> to vector<2x32xbf16>
    %cst_53 = arith.constant dense<0.000000e+00> : vector<2x128xf32>
    %250 = tpu.matmul %249, %3, %cst_53 {dimension_numbers = #tpu.dot_dimension_numbers<[1], [0], [0], [1], [0, 0, 1, 1], [], []>} : vector<2x32xbf16>, vector<32x128xbf16>, vector<2x128xf32> -> vector<2x128xf32>
    %251 = arith.addf %248, %250 : vector<2x128xf32>
    %252 = arith.negf %251 : vector<2x128xf32>
    %253 = math.exp %252 : vector<2x128xf32>
    %cst_54 = arith.constant 1.000000e+00 : f32
    %254 = vector.broadcast %cst_54 : f32 to vector<2x128xf32>
    %255 = arith.addf %254, %253 : vector<2x128xf32>
    %256 = arith.divf %254, %255 : vector<2x128xf32>
    %257 = math.tanh %251 : vector<2x128xf32>
    %258 = vector.extract_strided_slice %256 {offsets = [0, 0], sizes = [2, 32], strides = [1, 1]} : vector<2x128xf32> to vector<2x32xf32>
    %259 = vector.extract_strided_slice %256 {offsets = [0, 32], sizes = [2, 32], strides = [1, 1]} : vector<2x128xf32> to vector<2x32xf32>
    %260 = vector.extract_strided_slice %257 {offsets = [0, 64], sizes = [2, 32], strides = [1, 1]} : vector<2x128xf32> to vector<2x32xf32>
    %261 = vector.extract_strided_slice %256 {offsets = [0, 96], sizes = [2, 32], strides = [1, 1]} : vector<2x128xf32> to vector<2x32xf32>
    %262 = arith.mulf %259, %223 : vector<2x32xf32>
    %263 = arith.mulf %258, %260 : vector<2x32xf32>
    %264 = arith.addf %262, %263 : vector<2x32xf32>
    %265 = math.tanh %264 : vector<2x32xf32>
    %266 = arith.mulf %261, %265 : vector<2x32xf32>
    %267 = vector.extract_strided_slice %12 {offsets = [12, 0], sizes = [2, 128], strides = [1, 1]} : vector<16x128xf32> to vector<2x128xf32>
    %268 = arith.truncf %244 : vector<2x32xf32> to vector<2x32xbf16>
    %cst_55 = arith.constant dense<0.000000e+00> : vector<2x128xf32>
    %269 = tpu.matmul %268, %2, %cst_55 {dimension_numbers = #tpu.dot_dimension_numbers<[1], [0], [0], [1], [0, 0, 1, 1], [], []>} : vector<2x32xbf16>, vector<32x128xbf16>, vector<2x128xf32> -> vector<2x128xf32>
    %270 = arith.addf %267, %269 : vector<2x128xf32>
    %271 = arith.negf %270 : vector<2x128xf32>
    %272 = math.exp %271 : vector<2x128xf32>
    %cst_56 = arith.constant 1.000000e+00 : f32
    %273 = vector.broadcast %cst_56 : f32 to vector<2x128xf32>
    %274 = arith.addf %273, %272 : vector<2x128xf32>
    %275 = arith.divf %273, %274 : vector<2x128xf32>
    %276 = math.tanh %270 : vector<2x128xf32>
    %277 = vector.extract_strided_slice %275 {offsets = [0, 0], sizes = [2, 32], strides = [1, 1]} : vector<2x128xf32> to vector<2x32xf32>
    %278 = vector.extract_strided_slice %275 {offsets = [0, 32], sizes = [2, 32], strides = [1, 1]} : vector<2x128xf32> to vector<2x32xf32>
    %279 = vector.extract_strided_slice %276 {offsets = [0, 64], sizes = [2, 32], strides = [1, 1]} : vector<2x128xf32> to vector<2x32xf32>
    %280 = vector.extract_strided_slice %275 {offsets = [0, 96], sizes = [2, 32], strides = [1, 1]} : vector<2x128xf32> to vector<2x32xf32>
    %281 = arith.mulf %278, %242 : vector<2x32xf32>
    %282 = arith.mulf %277, %279 : vector<2x32xf32>
    %283 = arith.addf %281, %282 : vector<2x32xf32>
    %284 = math.tanh %283 : vector<2x32xf32>
    %285 = arith.mulf %280, %284 : vector<2x32xf32>
    %286 = arith.truncf %285 : vector<2x32xf32> to vector<2x32xbf16>
    %cst_57 = arith.constant dense<0.000000e+00> : vector<2x128xf32>
    %287 = tpu.matmul %286, %1, %cst_57 {dimension_numbers = #tpu.dot_dimension_numbers<[1], [0], [0], [1], [0, 0, 1, 1], [], []>} : vector<2x32xbf16>, vector<32x128xbf16>, vector<2x128xf32> -> vector<2x128xf32>
    %288 = vector.broadcast %5 : vector<1x128xf32> to vector<2x128xf32>
    %289 = arith.addf %287, %288 : vector<2x128xf32>
    %290 = arith.truncf %266 : vector<2x32xf32> to vector<2x32xbf16>
    %cst_58 = arith.constant dense<0.000000e+00> : vector<2x128xf32>
    %291 = tpu.matmul %290, %3, %cst_58 {dimension_numbers = #tpu.dot_dimension_numbers<[1], [0], [0], [1], [0, 0, 1, 1], [], []>} : vector<2x32xbf16>, vector<32x128xbf16>, vector<2x128xf32> -> vector<2x128xf32>
    %292 = arith.addf %289, %291 : vector<2x128xf32>
    %293 = arith.negf %292 : vector<2x128xf32>
    %294 = math.exp %293 : vector<2x128xf32>
    %cst_59 = arith.constant 1.000000e+00 : f32
    %295 = vector.broadcast %cst_59 : f32 to vector<2x128xf32>
    %296 = arith.addf %295, %294 : vector<2x128xf32>
    %297 = arith.divf %295, %296 : vector<2x128xf32>
    %298 = math.tanh %292 : vector<2x128xf32>
    %299 = vector.extract_strided_slice %297 {offsets = [0, 0], sizes = [2, 32], strides = [1, 1]} : vector<2x128xf32> to vector<2x32xf32>
    %300 = vector.extract_strided_slice %297 {offsets = [0, 32], sizes = [2, 32], strides = [1, 1]} : vector<2x128xf32> to vector<2x32xf32>
    %301 = vector.extract_strided_slice %298 {offsets = [0, 64], sizes = [2, 32], strides = [1, 1]} : vector<2x128xf32> to vector<2x32xf32>
    %302 = vector.extract_strided_slice %297 {offsets = [0, 96], sizes = [2, 32], strides = [1, 1]} : vector<2x128xf32> to vector<2x32xf32>
    %303 = arith.mulf %300, %264 : vector<2x32xf32>
    %304 = arith.mulf %299, %301 : vector<2x32xf32>
    %305 = arith.addf %303, %304 : vector<2x32xf32>
    %306 = math.tanh %305 : vector<2x32xf32>
    %307 = arith.mulf %302, %306 : vector<2x32xf32>
    %308 = vector.extract_strided_slice %12 {offsets = [14, 0], sizes = [2, 128], strides = [1, 1]} : vector<16x128xf32> to vector<2x128xf32>
    %309 = arith.truncf %285 : vector<2x32xf32> to vector<2x32xbf16>
    %cst_60 = arith.constant dense<0.000000e+00> : vector<2x128xf32>
    %310 = tpu.matmul %309, %2, %cst_60 {dimension_numbers = #tpu.dot_dimension_numbers<[1], [0], [0], [1], [0, 0, 1, 1], [], []>} : vector<2x32xbf16>, vector<32x128xbf16>, vector<2x128xf32> -> vector<2x128xf32>
    %311 = arith.addf %308, %310 : vector<2x128xf32>
    %312 = arith.negf %311 : vector<2x128xf32>
    %313 = math.exp %312 : vector<2x128xf32>
    %cst_61 = arith.constant 1.000000e+00 : f32
    %314 = vector.broadcast %cst_61 : f32 to vector<2x128xf32>
    %315 = arith.addf %314, %313 : vector<2x128xf32>
    %316 = arith.divf %314, %315 : vector<2x128xf32>
    %317 = math.tanh %311 : vector<2x128xf32>
    %318 = vector.extract_strided_slice %316 {offsets = [0, 0], sizes = [2, 32], strides = [1, 1]} : vector<2x128xf32> to vector<2x32xf32>
    %319 = vector.extract_strided_slice %316 {offsets = [0, 32], sizes = [2, 32], strides = [1, 1]} : vector<2x128xf32> to vector<2x32xf32>
    %320 = vector.extract_strided_slice %317 {offsets = [0, 64], sizes = [2, 32], strides = [1, 1]} : vector<2x128xf32> to vector<2x32xf32>
    %321 = vector.extract_strided_slice %316 {offsets = [0, 96], sizes = [2, 32], strides = [1, 1]} : vector<2x128xf32> to vector<2x32xf32>
    %322 = arith.mulf %319, %283 : vector<2x32xf32>
    %323 = arith.mulf %318, %320 : vector<2x32xf32>
    %324 = arith.addf %322, %323 : vector<2x32xf32>
    %325 = math.tanh %324 : vector<2x32xf32>
    %326 = arith.mulf %321, %325 : vector<2x32xf32>
    %327 = arith.truncf %326 : vector<2x32xf32> to vector<2x32xbf16>
    %cst_62 = arith.constant dense<0.000000e+00> : vector<2x128xf32>
    %328 = tpu.matmul %327, %1, %cst_62 {dimension_numbers = #tpu.dot_dimension_numbers<[1], [0], [0], [1], [0, 0, 1, 1], [], []>} : vector<2x32xbf16>, vector<32x128xbf16>, vector<2x128xf32> -> vector<2x128xf32>
    %329 = vector.broadcast %5 : vector<1x128xf32> to vector<2x128xf32>
    %330 = arith.addf %328, %329 : vector<2x128xf32>
    %331 = arith.truncf %307 : vector<2x32xf32> to vector<2x32xbf16>
    %cst_63 = arith.constant dense<0.000000e+00> : vector<2x128xf32>
    %332 = tpu.matmul %331, %3, %cst_63 {dimension_numbers = #tpu.dot_dimension_numbers<[1], [0], [0], [1], [0, 0, 1, 1], [], []>} : vector<2x32xbf16>, vector<32x128xbf16>, vector<2x128xf32> -> vector<2x128xf32>
    %333 = arith.addf %330, %332 : vector<2x128xf32>
    %334 = arith.negf %333 : vector<2x128xf32>
    %335 = math.exp %334 : vector<2x128xf32>
    %cst_64 = arith.constant 1.000000e+00 : f32
    %336 = vector.broadcast %cst_64 : f32 to vector<2x128xf32>
    %337 = arith.addf %336, %335 : vector<2x128xf32>
    %338 = arith.divf %336, %337 : vector<2x128xf32>
    %339 = math.tanh %333 : vector<2x128xf32>
    %340 = vector.extract_strided_slice %338 {offsets = [0, 0], sizes = [2, 32], strides = [1, 1]} : vector<2x128xf32> to vector<2x32xf32>
    %341 = vector.extract_strided_slice %338 {offsets = [0, 32], sizes = [2, 32], strides = [1, 1]} : vector<2x128xf32> to vector<2x32xf32>
    %342 = vector.extract_strided_slice %339 {offsets = [0, 64], sizes = [2, 32], strides = [1, 1]} : vector<2x128xf32> to vector<2x32xf32>
    %343 = vector.extract_strided_slice %338 {offsets = [0, 96], sizes = [2, 32], strides = [1, 1]} : vector<2x128xf32> to vector<2x32xf32>
    %344 = arith.mulf %341, %305 : vector<2x32xf32>
    %345 = arith.mulf %340, %342 : vector<2x32xf32>
    %346 = arith.addf %344, %345 : vector<2x32xf32>
    %347 = math.tanh %346 : vector<2x32xf32>
    %348 = arith.mulf %343, %347 : vector<2x32xf32>
    %349 = arith.truncf %348 : vector<2x32xf32> to vector<2x32xbf16>
    %c0_65 = arith.constant 0 : index
    %c0_66 = arith.constant 0 : index
    %350 = vector.load %arg9[%c0_65, %c0_66] : memref<32x4xbf16, #tpu.memory_space<vmem>>, vector<32x4xbf16>
    %cst_67 = arith.constant dense<0.000000e+00> : vector<2x4xf32>
    %351 = tpu.matmul %349, %350, %cst_67 {dimension_numbers = #tpu.dot_dimension_numbers<[1], [0], [0], [1], [0, 0, 1, 1], [], []>} : vector<2x32xbf16>, vector<32x4xbf16>, vector<2x4xf32> -> vector<2x4xf32>
    %c0_68 = arith.constant 0 : index
    %c0_69 = arith.constant 0 : index
    %352 = vector.load %arg10[%c0_68, %c0_69] : memref<1x4xf32, #tpu.memory_space<vmem>>, vector<1x4xf32>
    %353 = vector.broadcast %352 : vector<1x4xf32> to vector<2x4xf32>
    %354 = arith.addf %351, %353 : vector<2x4xf32>
    %c0_70 = arith.constant 0 : index
    %c0_71 = arith.constant 0 : index
    %355 = vector.load %arg11[%c0_70, %c0_71] : memref<2x4xf32, #tpu.memory_space<vmem>>, vector<2x4xf32>
    tpu.vector_store %arg11[%c0_70, %c0_71], %354 {strides = array<i32>} : memref<2x4xf32, #tpu.memory_space<vmem>>, vector<2x4xf32>,
    return
  }
}

</mosaic_0001>

<bundles_post_ra>
// kernel: tpu_custom_call.1
= control target key start
LH: loop header
LB: loop body
LE: loop exit
PB: predicated region body
PF: predicated region fallthrough
CT: control target
= control target key end

     0   :  { %16 = vsyncpa [#allocation3], 0  ;;  %s2238_s0 = inlined_call_operand.vmem [shape: f32[2,8,16], index: 0, kind: input, shape index: {}]   ;;  %s2239_s1 = inlined_call_operand.hbm [shape: f32[2,2,32], index: 1, kind: input, shape index: {}]   ;;  %s2240_s2 = inlined_call_operand.hbm [shape: f32[2,2,32], index: 2, kind: input, shape index: {}]   ;;  %s2241_s3 = inlined_call_operand.hbm [shape: bf16[16,128], index: 3, kind: input, shape index: {}]   ;;  %s2242_s4 = inlined_call_operand.hbm [shape: bf16[32,128], index: 4, kind: input, shape index: {}]   ;;  %s2243_s5 = inlined_call_operand.vmem [shape: f32[1,128], index: 5, kind: input, shape index: {}]   ;;  %s2244_s6 = inlined_call_operand.hbm [shape: bf16[32,128], index: 6, kind: input, shape index: {}]   ;;  %s2245_s7 = inlined_call_operand.hbm [shape: bf16[32,128], index: 7, kind: input, shape index: {}]   ;;  %s2246_s8 = inlined_call_operand.vmem [shape: f32[1,128], index: 8, kind: input, shape index: {}]   ;;  %s2247_s9 = inlined_call_operand.vmem [shape: bf16[32,4], index: 9, kind: input, shape index: {}]   ;;  %s2248_s10 = inlined_call_operand.vmem [shape: f32[1,4], index: 10, kind: input, shape index: {}]   ;;  %s2249_s11 = inlined_call_operand.hbm [shape: f32[2,4], index: 11, kind: output, shape index: {}]  }
   0x1   :  { %17 = vsyncpa [#allocation6], 0 }
   0x2   :  { %18 = vsyncpa [#allocation9], 0 }
   0x3   :  { %19 = vsyncpa [#allocation12], 0 }
   0x4   :  { %20 = vsyncpa [#allocation4], 0  ;;  %s40_s19 = sshll.u32 %s2240_s2, 4  ;;  %s1864_s20 = smov [#allocation5]   ;;  %s41_s19 = int_to_ptr.hbm [resolvable:$true] %s40_s19 }
   0x5   :  { %s42_s21 = sshll.u32 %s1864_s20, 4  ;;  %s1865_s22 = smov 32   ;;  %s43_s21 = int_to_ptr.vmem [resolvable:$true] %s42_s21 }
   0x6   :  { %s1866_s23 = smov 2   ;;  %s66_s26 = sshll.u32 %s2242_s4, 4  ;;  %s67_s26 = int_to_ptr.hbm [resolvable:$true] %s66_s26 }
   0x7   :  { %48 = dma.hbm_to_vmem [thread:$0]  %s41_s19, 64, %s43_s21, [#allocation6], %s1865_s22, %s1865_s22, %s1866_s23  }
   0x8   :  { %s1867_s27 = smov [#allocation8]   ;;  %s27_s2 = sshll.u32 %s2239_s1, 4  ;;  %s28_s2 = int_to_ptr.hbm [resolvable:$true] %s27_s2 }
   0x9   :  { %s68_s28 = sshll.u32 %s1867_s27, 4  ;;  %s1868_s12 = smov 64   ;;  %s69_s28 = int_to_ptr.vmem [resolvable:$true] %s68_s28 }
   0xa   :  { %s1869_s13 = smov 4   ;;  %s53_s16 = sshll.u32 %s2241_s3, 4  ;;  %s54_s16 = int_to_ptr.hbm [resolvable:$true] %s53_s16 }
   0xb   :  { %74 = dma.hbm_to_vmem [thread:$0]  %s67_s26, 256, %s69_s28, [#allocation9], %s1868_s12, %s1868_s12, %s1869_s13  }
   0xc   :  { %s1870_s17 = smov [#allocation2]   ;;  %s1871_s18 = smov [#allocation7]  }
   0xd   :  { %s29_s4 = sshll.u32 %s1870_s17, 4  ;;  %s55_s1 = sshll.u32 %s1871_s18, 4  ;;  %s30_s4 = int_to_ptr.vmem [resolvable:$true] %s29_s4  ;;  %s56_s1 = int_to_ptr.vmem [resolvable:$true] %s55_s1 }
   0xe   :  { %35 = dma.hbm_to_vmem [thread:$0]  %s28_s2, 64, %s30_s4, [#allocation3], %s1865_s22, %s1865_s22, %s1866_s23  }
   0xf   :  { %s81_s21 = sshll.u32 %s2244_s6, 4  ;;  %s94_s25 = sshll.u32 %s2245_s7, 4  ;;  %s82_s21 = int_to_ptr.hbm [resolvable:$true] %s81_s21  ;;  %s95_s25 = int_to_ptr.hbm [resolvable:$true] %s94_s25 }
  0x10   :  { %61 = dma.hbm_to_vmem [thread:$0]  %s54_s16, 128, %s56_s1, [#allocation6], %s1868_s12, %s1868_s12, %s1869_s13  }
  0x11   :  { %s1872_s26 = smov [#allocation10]   ;;  %s1873_s23 = smov [#allocation11]  }
  0x12   :  { %s83_s27 = sshll.u32 %s1872_s26, 4  ;;  %s96_s28 = sshll.u32 %s1873_s23, 4  ;;  %s84_s27 = int_to_ptr.vmem [resolvable:$true] %s83_s27  ;;  %s97_s28 = int_to_ptr.vmem [resolvable:$true] %s96_s28 }
  0x13   :  { %89 = dma.hbm_to_vmem [thread:$0]  %s82_s21, 256, %s84_s27, [#allocation9], %s1868_s12, %s1868_s12, %s1869_s13  }
  0x14   :  { %102 = dma.hbm_to_vmem [thread:$0]  %s95_s25, 256, %s97_s28, [#allocation12], %s1868_s12, %s1868_s12, %s1869_s13  }
  0x15   :  { %1854 = dma.done.wait [#allocation3], 64  }
  0x16   :  { %1855 = vsyncadd [#allocation3], 4294967232 }
  0x17   :  { %1856 = dma.done.wait [#allocation6], 192  }
  0x18   :  { %1857 = vsyncadd [#allocation6], 4294967104 }
  0x19   :  { %1858 = dma.done.wait [#allocation9], 512  }
  0x1a   :  { %1859 = vsyncadd [#allocation9], 4294966784 }
  0x1b   :  { %1860 = dma.done.wait [#allocation12], 256  }
  0x1c   :  { %1861 = vsyncadd [#allocation12], 4294967040  ;;  %v1874_v0 = vmov 1983009808   ;;  %v1875_v3 = vmov 1934713408  }
  0x1d   :  { %v156_v1 = vunpack.c.l.s4 %v1874_v0  ;;  %v178_v4 = vunpack.c.l.s4 %v1875_v3  ;;  %v1967_v5 = vld [vmem:[#allocation8 + $0x8] sm:$0xff]  ;;  %v1969_v6 = vld [vmem:[#allocation8] sm:$0xff]  ;;  %v260_v7 = vld [vmem:[#allocation2] sm:$0x3]  ;;  %vm153_vm0 = vcmask 1047556   ;;  %vm279_vm1 = vcmask 261120  }
  0x1e   :  { %v1532_v8 = vld [vmem:[#allocation7] sm:$0xff]  ;;  %v150_v9 = vld [vmem:[%s2238_s0] sm:$0xff]  ;;  %v151_v10 = vld [vmem:[%s2238_s0 + $0x8] sm:$0xff]  ;;  %289 = vmatpush.bf16.msra.mxu1 %v1967_v5  ;;  %v266_v20 = vpack.c.bf16 %v260_v7, %v260_v7  ;;  %vm242_vm2 = vcmask 130048   ;;  %s1876_s1 = smov [#allocation13]   ;;  %s1441_s24 = sshll.u32 %s2249_s11, 4  ;;  %s1442_s24 = int_to_ptr.hbm [resolvable:$true] %s1441_s24 }
  0x1f   :  { %v157_v2 = vunpack.c.0.s8 %v156_v1  ;;  %v152_v11 = vrot.slane %v150_v9, 4  ;;  %v163_v13 = vrot.slane %v151_v10, 4  ;;  %253 = vmatpush.bf16.msra.mxu0 %v1532_v8  ;;  %v179_v15 = vunpack.c.0.s8 %v178_v4  ;;  %v1995_v46 = vld [vmem:[%s2243_s5] ss:$0 sm:$0xff]  ;;  %v263_v51 = vld [vmem:[#allocation5] sm:$0x3] }
  0x20   :  { %s1439_s19 = sshll.u32 %s1876_s1, 4  ;;  %s1440_s19 = int_to_ptr.vmem [resolvable:$true] %s1439_s19 }
  0x21   :  { %v158_v12 = vperm.slane %v150_v9, %v157_v2  ;;  %v168_v14 = vperm.slane %v151_v10, %v157_v2  ;;  %v154_v16 = vsel %vm153_vm0, 0.0, %v152_v11  ;;  %v164_v17 = vsel %vm153_vm0, 0.0, %v163_v13  ;;  %v2008_v10 = vld [vmem:[#allocation10 + $0x8] sm:$0xff]  ;;  %v2010_v11 = vld [vmem:[#allocation11 + $0x8] sm:$0xff]  ;;  %v2016_v13 = vld [vmem:[#allocation11] sm:$0xff] }
  0x22   :  { %v162_v21 = vperm.slane %v154_v16, %v157_v2  ;;  %v172_v22 = vperm.slane %v164_v17, %v157_v2  ;;  %290 = vmatpush.bf16.msra.mxu1 %v1969_v6  ;;  %366 = vmatpush.bf16.msra.mxu2 %v2008_v10  ;;  %v262_v17 = vld [vmem:[#allocation2 + $0x2] sm:$0x3] }
  0x23   :  { %v173_v18 = vrot.slane %v168_v14, 4  ;;  %v175_v19 = vrot.slane %v158_v12, 4  ;;  %450 = vmatpush.bf16.msrb.mxu0 %v1967_v5  ;;  %395 = vmatpush.bf16.msra.mxu3 %v2010_v11 }
  0x24   :  { %v185_v27 = vrot.slane %v172_v22, 4  ;;  %v187_v28 = vrot.slane %v162_v21, 4 }
  0x25   :  { %v174_v23 = vsel %vm153_vm0, %v173_v18, %v158_v12  ;;  %v176_v24 = vsel %vm153_vm0, %v168_v14, %v175_v19  ;;  %1467 = vmatmul.msk.bf16.vlgmr.msra.gmra.mxu1 %vm279_vm1, %v266_v20  ;;  %v2014_v12 = vld [vmem:[#allocation10] sm:$0xff]  ;;  %v373_v18 = vpack.c.bf16 %v262_v17, %v262_v17 }
  0x26   :  { %v180_v25 = vperm.slane %v174_v23, %v179_v15  ;;  %v184_v26 = vperm.slane %v176_v24, %v179_v15  ;;  %v186_v29 = vsel %vm153_vm0, %v185_v27, %v162_v21  ;;  %v188_v30 = vsel %vm153_vm0, %v172_v22, %v187_v28  ;;  %515 = vmatpush.bf16.msrb.mxu1 %v2008_v10 }
  0x27   :  { %451 = vmatpush.bf16.msrb.mxu0 %v1969_v6  ;;  %v192_v33 = vperm.slane %v186_v29, %v179_v15  ;;  %v196_v34 = vperm.slane %v188_v30, %v179_v15  ;;  %367 = vmatpush.bf16.msra.mxu2 %v2014_v12 }
  0x28   :  { %v197_v31 = vrot.slane %v180_v25, 4  ;;  %v199_v32 = vrot.slane %v184_v26, 4  ;;  %213 = vst [vmem:[#allocation1] ss:$4 sm:$0xff] %v180_v25  ;;  %396 = vmatpush.bf16.msra.mxu3 %v2016_v13 }
  0x29   :  { %217 = vst [vmem:[#allocation1 + $0x2] ss:$4 sm:$0xff] %v184_v26  ;;  %v201_v37 = vrot.slane %v192_v33, 4  ;;  %v203_v38 = vrot.slane %v196_v34, 4  ;;  %v2046_v26 = vld [vmem:[%s2246_s8] ss:$0 sm:$0xff] }
  0x2a   :  { %v198_v35 = vsel %vm153_vm0, 0.0, %v197_v31  ;;  %v200_v36 = vsel %vm153_vm0, 0.0, %v199_v32  ;;  %221 = vst [vmem:[#allocation1 + $0x20] ss:$4 sm:$0xff] %v192_v33  ;;  %516 = vmatpush.bf16.msrb.mxu1 %v2014_v12 }
  0x2b   :  { %215 = vst [vmem:[#allocation1 + $0x1] ss:$4 sm:$0xff] %v198_v35  ;;  %v202_v39 = vsel %vm153_vm0, 0.0, %v201_v37  ;;  %v204_v40 = vsel %vm153_vm0, 0.0, %v203_v38  ;;  %535 = vmatpush.bf16.msrb.mxu2 %v2010_v11  ;;  %1486 = vmatmul.msk.bf16.vlgmr.msra.gmra.mxu3 %vm279_vm1, %v373_v18 }
  0x2c   :  { %219 = vst [vmem:[#allocation1 + $0x3] ss:$4 sm:$0xff] %v200_v36  ;;  %586 = vmatpush.bf16.msrb.mxu3 %v1967_v5 }
  0x2d   :  { %223 = vst [vmem:[#allocation1 + $0x21] ss:$4 sm:$0xff] %v202_v39 }
  0x2e   :  { %225 = vst [vmem:[#allocation1 + $0x22] ss:$4 sm:$0xff] %v196_v34  ;;  %671 = vmatpush.bf16.msra.mxu1 %v2010_v11  ;;  %v265_v34 = vld [vmem:[#allocation5 + $0x2] sm:$0x3] }
  0x2f   :  { %227 = vst [vmem:[#allocation1 + $0x23] ss:$4 sm:$0xff] %v204_v40  ;;  %536 = vmatpush.bf16.msrb.mxu2 %v2016_v13 }
  0x30   :  { %587 = vmatpush.bf16.msrb.mxu3 %v1969_v6 }
  0x32   :  { %672 = vmatpush.bf16.msra.mxu1 %v2016_v13 }
  0x33   :  { %v228_v41 = vld.sshfl [vmem:[#allocation1] sm:$0xff pattern:$0x73625140] }
  0x34   :  { %787 = vmatpush.bf16.msra.mxu3 %v2008_v10 }
  0x36   :  { %v229_v42 = vld.sshfl [vmem:[#allocation1 + $0x20] sm:$0xff pattern:$0x73625140] }
  0x37   :  { %v232_v43 = vpack.c.bf16 %v229_v42, %v228_v41 }
  0x38   :  { %788 = vmatpush.bf16.msra.mxu3 %v2014_v12 }
  0x39   :  { %1458 = vmatmul.msk.bf16.vlgmr.msra.gmra.mxu0 %vm242_vm2, %v232_v43 }
  0x3a   :  { %651 = vmatpush.bf16.msra.mxu0 %v2008_v10 }
  0x3e   :  { %652 = vmatpush.bf16.msra.mxu0 %v2014_v12 }
  0xa2   :  { %v292_v44 = vpop.f32.mrf.mxu1 }
  0xaa   :  { %v294_v45 = vpop.f32.mrf.mxu1 }
  0xae   :  { %v398_v20 = vpop.f32.mrf.mxu3 }
  0xb6   :  { %v255_v47 = vpop.f32.mrf.mxu0  ;;  %v400_v21 = vpop.f32.mrf.mxu3 }
  0xb7   :  { %v1998_v48 = vadd.f32 %v1995_v46, %v255_v47 }
  0xb9   :  { %v296_v49 = vadd.f32 %v292_v44, %v1998_v48 }
  0xbb   :  { %1557 = vtanh.f32 %v296_v49  ;;  %v1468_v52 = vmul.f32 -1.442695, %v296_v49 }
  0xbd   :  { %1559 = vpow2.f32 %v1468_v52 }
  0xbe   :  { %v2040_v22 = vpop.f32.mrf.mxu0 }
  0xc1   :  { %v1558_v50 = vpop.eup %1557 }
  0xc2   :  { %323 = vrot.lane.b32.xlu0 %v1558_v50, %s1868_s12 }
  0xc3   :  { %v1560_v53 = vpop.eup %1559 }
  0xc4   :  { %v300_v54 = vadd.f32 1.0, %v1560_v53 }
  0xc6   :  { %1561 = vrcp.f32 %v300_v54  ;;  %v312_v60 = vand.u32 2147483648, %v300_v54  ;;  %vm306_vm4 = vweird.f32 %v300_v54  ;;  %v310_v61 = vand.u32 2147483647, %v300_v54 }
  0xc8   :  { %v313_v63 = vor.u32 1.1754944e-38, %v312_v60  ;;  %vm311_vm6 = vcmp.eq.f32.partialorder %v310_v61, 8.507059e+37 }
  0xca   :  { %318 = vrot.lane.b32.xlu0 %v263_v51, %s1865_s22 }
  0xcc   :  { %v1562_v55 = vpop.eup %1561 }
  0xcd   :  { %v302_v56 = vmul.f32 %v1562_v55, %v300_v54  ;;  %vm307_vm3 = vweird.f32 %v1562_v55 }
  0xce   :  { %vm308_vm5 = vmor %vm306_vm4, %vm307_vm3 }
  0xcf   :  { %v303_v57 = vsub.f32 1.0, %v302_v56 }
  0xd1   :  { %v304_v58 = vmul.f32 %v1562_v55, %v303_v57 }
  0xd3   :  { %v305_v59 = vadd.f32 %v1562_v55, %v304_v58 }
  0xd5   :  { %v309_v62 = vsel %vm308_vm5, %v1562_v55, %v305_v59 }
  0xd6   :  { %v314_v1 = vsel %vm311_vm6, %v313_v63, %v309_v62 }
 0x134   :  { %v324_v0 = vpop.permute.xlu0 %323 }
 0x135   :  { %v326_v2 = vmul.f32 %v324_v0, %v314_v1 }
 0x137   :  { %328 = vrot.lane.b32.xlu1 %v326_v2, %s1865_s22 }
 0x13c   :  { %v319_v3 = vpop.permute.xlu0 %318 }
 0x13d   :  { %v321_v4 = vmul.f32 %v319_v3, %v314_v1 }
 0x1a9   :  { %v329_v7 = vpop.permute.xlu1 %328 }
 0x1aa   :  { %v2004_v8 = vadd.f32 %v329_v7, %v321_v4 }
 0x1ac   :  { %1563 = vtanh.f32 %v2004_v8  ;;  %v482_v3 = vrot.slane %v2004_v8, 6 }
 0x1b2   :  { %v1564_v9 = vpop.eup %1563 }
 0x1b3   :  { %334 = vrot.lane.b32.xlu1 %v1564_v9, %s1868_s12 }
 0x225   :  { %v335_v14 = vpop.permute.xlu1 %334 }
 0x226   :  { %v337_v15 = vmul.f32 %v335_v14, %v314_v1 }
 0x228   :  { %v338_v16 = vpack.c.bf16 %v337_v15, %v337_v15 }
 0x22a   :  { %343 = vrot.lane.b32.xlu2 %v338_v16, %s1865_s22 }
 0x284   :  { %v344_v19 = vpop.permute.xlu2 %343 }
 0x285   :  { %1477 = vmatmul.msk.bf16.vlgmr.msra.gmra.mxu2 %vm279_vm1, %v344_v19  ;;  %1488 = vmatmul.msk.bf16.vlgmr.msrb.gmra.mxu0 %vm279_vm1, %v344_v19 }
 0x286   :  { %722 = vmatpush.bf16.msra.mxu2 %v1967_v5  ;;  %807 = vmatpush.bf16.msrb.mxu0 %v2010_v11 }
 0x28a   :  { %723 = vmatpush.bf16.msra.mxu2 %v1969_v6  ;;  %808 = vmatpush.bf16.msrb.mxu0 %v2016_v13 }
 0x302   :  { %v453_v23 = vpop.f32.mrf.mxu0 }
 0x303   :  { %v458_v24 = vrot.slane %v453_v23, 6 }
 0x305   :  { %v460_v25 = vadd.f32 %v458_v24, %v1998_v48 }
 0x307   :  { %1565 = vtanh.f32 %v460_v25  ;;  %v1489_v35 = vmul.f32 -1.442695, %v460_v25 }
 0x308   :  { %v369_v27 = vpop.f32.mrf.mxu2 }
 0x309   :  { %v370_v28 = vadd.f32 %v2046_v26, %v369_v27 }
 0x30a   :  { %v455_v29 = vpop.f32.mrf.mxu0 }
 0x30b   :  { %v402_v30 = vadd.f32 %v398_v20, %v370_v28 }
 0x30d   :  { %v1566_v31 = vpop.eup %1565  ;;  %1567 = vtanh.f32 %v402_v30  ;;  %v1487_v40 = vmul.f32 -1.442695, %v402_v30 }
 0x30e   :  { %486 = vrot.lane.b32.xlu2 %v1566_v31, %s1868_s12  ;;  %1569 = vpow2.f32 %v1489_v35 }
 0x310   :  { %v371_v32 = vpop.f32.mrf.mxu2 }
 0x313   :  { %v1568_v33 = vpop.eup %1567 }
 0x314   :  { %429 = vrot.lane.b32.xlu0 %v1568_v33, %s1868_s12  ;;  %v1570_v36 = vpop.eup %1569 }
 0x315   :  { %v464_v37 = vadd.f32 1.0, %v1570_v36 }
 0x316   :  { %424 = vrot.lane.b32.xlu2 %v265_v34, %s1865_s22 }
 0x317   :  { %1571 = vrcp.f32 %v464_v37  ;;  %v476_v44 = vand.u32 2147483648, %v464_v37  ;;  %vm470_vm8 = vweird.f32 %v464_v37  ;;  %v474_v47 = vand.u32 2147483647, %v464_v37 }
 0x318   :  { %1573 = vpow2.f32 %v1487_v40 }
 0x319   :  { %v477_v51 = vor.u32 1.1754944e-38, %v476_v44  ;;  %vm475_vm10 = vcmp.eq.f32.partialorder %v474_v47, 8.507059e+37 }
 0x31d   :  { %v1572_v38 = vpop.eup %1571 }
 0x31e   :  { %v466_v39 = vmul.f32 %v1572_v38, %v464_v37  ;;  %vm471_vm7 = vweird.f32 %v1572_v38  ;;  %v1574_v45 = vpop.eup %1573 }
 0x31f   :  { %vm472_vm9 = vmor %vm470_vm8, %vm471_vm7  ;;  %v406_v50 = vadd.f32 1.0, %v1574_v45 }
 0x320   :  { %v467_v41 = vsub.f32 1.0, %v466_v39 }
 0x321   :  { %1575 = vrcp.f32 %v406_v50  ;;  %v418_v60 = vand.u32 2147483648, %v406_v50  ;;  %vm412_vm12 = vweird.f32 %v406_v50  ;;  %v416_v61 = vand.u32 2147483647, %v406_v50 }
 0x322   :  { %v468_v42 = vmul.f32 %v1572_v38, %v467_v41 }
 0x323   :  { %v419_v63 = vor.u32 1.1754944e-38, %v418_v60  ;;  %vm417_vm14 = vcmp.eq.f32.partialorder %v416_v61, 8.507059e+37 }
 0x324   :  { %v469_v43 = vadd.f32 %v1572_v38, %v468_v42 }
 0x326   :  { %v473_v49 = vsel %vm472_vm9, %v1572_v38, %v469_v43 }
 0x327   :  { %v478_v53 = vsel %vm475_vm10, %v477_v51, %v473_v49  ;;  %v1576_v55 = vpop.eup %1575 }
 0x328   :  { %v408_v56 = vmul.f32 %v1576_v55, %v406_v50  ;;  %vm413_vm11 = vweird.f32 %v1576_v55  ;;  %v484_v4 = vmul.f32 %v482_v3, %v478_v53 }
 0x329   :  { %vm414_vm13 = vmor %vm412_vm12, %vm413_vm11 }
 0x32a   :  { %v409_v57 = vsub.f32 1.0, %v408_v56 }
 0x32c   :  { %v410_v58 = vmul.f32 %v1576_v55, %v409_v57 }
 0x32e   :  { %v411_v59 = vadd.f32 %v1576_v55, %v410_v58 }
 0x330   :  { %v415_v62 = vsel %vm414_vm13, %v1576_v55, %v411_v59 }
 0x331   :  { %v420_v0 = vsel %vm417_vm14, %v419_v63, %v415_v62 }
 0x368   :  { %v487_v52 = vpop.permute.xlu2 %486 }
 0x369   :  { %v489_v54 = vmul.f32 %v487_v52, %v478_v53 }
 0x36b   :  { %491 = vrot.lane.b32.xlu1 %v489_v54, %s1865_s22 }
 0x370   :  { %v425_v15 = vpop.permute.xlu2 %424 }
 0x371   :  { %v427_v16 = vmul.f32 %v425_v15, %v420_v0 }
 0x386   :  { %v430_v1 = vpop.permute.xlu0 %429 }
 0x387   :  { %v432_v2 = vmul.f32 %v430_v1, %v420_v0 }
 0x389   :  { %434 = vrot.lane.b32.xlu0 %v432_v2, %s1865_s22 }
 0x3dd   :  { %v492_v7 = vpop.permute.xlu1 %491 }
 0x3de   :  { %v2055_v9 = vadd.f32 %v492_v7, %v484_v4 }
 0x3e0   :  { %1577 = vtanh.f32 %v2055_v9 }
 0x3e6   :  { %v1578_v14 = vpop.eup %1577 }
 0x3e7   :  { %497 = vrot.lane.b32.xlu1 %v1578_v14, %s1868_s12 }
 0x3fb   :  { %v435_v17 = vpop.permute.xlu0 %434 }
 0x3fc   :  { %v2059_v18 = vadd.f32 %v435_v17, %v427_v16 }
 0x3fe   :  { %1579 = vtanh.f32 %v2059_v18 }
 0x404   :  { %v1580_v19 = vpop.eup %1579 }
 0x405   :  { %440 = vrot.lane.b32.xlu2 %v1580_v19, %s1868_s12  ;;  %v618_v19 = vrot.slane %v2055_v9, 6 }
 0x459   :  { %v498_v8 = vpop.permute.xlu1 %497 }
 0x45a   :  { %v500_v20 = vmul.f32 %v498_v8, %v478_v53 }
 0x45c   :  { %v501_v21 = vpack.c.bf16 %v500_v20, %v500_v20 }
 0x45e   :  { %v503_v23 = vrot.slane %v501_v21, 1 }
 0x45f   :  { %v441_v24 = vpop.permute.xlu2 %440 }
 0x460   :  { %v443_v25 = vmul.f32 %v441_v24, %v420_v0  ;;  %504 = vrot.lane.b32.xlu0 %v503_v23, %s1865_s22 }
 0x462   :  { %v522_v27 = vpack.c.bf16 %v443_v25, %v443_v25 }
 0x464   :  { %524 = vrot.lane.b32.xlu1 %v522_v27, %s1865_s22 }
 0x4d2   :  { %v505_v28 = vpop.permute.xlu0 %504 }
 0x4d3   :  { %1490 = vmatmul.msk.bf16.vlgmr.msrb.gmra.mxu1 %vm279_vm1, %v505_v28  ;;  %1493 = vmatmul.msk.bf16.vlgmr.msrb.gmra.mxu3 %vm279_vm1, %v505_v28 }
 0x4d4   :  { %858 = vmatpush.bf16.msrb.mxu1 %v1967_v5  ;;  %939 = vmatpush.bf16.msrb.mxu3 %v2010_v11 }
 0x4d6   :  { %v525_v29 = vpop.permute.xlu1 %524 }
 0x4d7   :  { %1491 = vmatmul.msk.bf16.vlgmr.msrb.gmra.mxu2 %vm279_vm1, %v525_v29 }
 0x4d8   :  { %859 = vmatpush.bf16.msrb.mxu1 %v1969_v6  ;;  %919 = vmatpush.bf16.msrb.mxu2 %v2008_v10 }
 0x4d9   :  { %940 = vmatpush.bf16.msrb.mxu3 %v2016_v13 }
 0x4dc   :  { %920 = vmatpush.bf16.msrb.mxu2 %v2014_v12 }
 0x550   :  { %v518_v30 = vpop.f32.mrf.mxu1 }
 0x551   :  { %v519_v34 = vadd.f32 %v2046_v26, %v518_v30 }
 0x556   :  { %v589_v31 = vpop.f32.mrf.mxu3 }
 0x557   :  { %v594_v32 = vrot.slane %v589_v31, 4 }
 0x558   :  { %v520_v33 = vpop.f32.mrf.mxu1 }
 0x559   :  { %v596_v35 = vadd.f32 %v594_v32, %v1998_v48 }
 0x55a   :  { %v538_v36 = vpop.f32.mrf.mxu2 }
 0x55b   :  { %1581 = vtanh.f32 %v596_v35  ;;  %v542_v37 = vadd.f32 %v538_v36, %v519_v34  ;;  %v1494_v42 = vmul.f32 -1.442695, %v596_v35 }
 0x55d   :  { %1583 = vtanh.f32 %v542_v37  ;;  %v1492_v49 = vmul.f32 -1.442695, %v542_v37 }
 0x55e   :  { %v591_v38 = vpop.f32.mrf.mxu3  ;;  %1585 = vpow2.f32 %v1494_v42 }
 0x561   :  { %v1582_v39 = vpop.eup %1581 }
 0x562   :  { %622 = vrot.lane.b32.xlu2 %v1582_v39, %s1868_s12  ;;  %v540_v40 = vpop.f32.mrf.mxu2 }
 0x563   :  { %v1584_v41 = vpop.eup %1583 }
 0x564   :  { %565 = vrot.lane.b32.xlu0 %v1584_v41, %s1868_s12  ;;  %v1586_v43 = vpop.eup %1585 }
 0x565   :  { %v600_v44 = vadd.f32 1.0, %v1586_v43 }
 0x567   :  { %1587 = vrcp.f32 %v600_v44  ;;  %v612_v54 = vand.u32 2147483648, %v600_v44  ;;  %vm606_vm0 = vweird.f32 %v600_v44  ;;  %v610_v56 = vand.u32 2147483647, %v600_v44 }
 0x568   :  { %1589 = vpow2.f32 %v1492_v49 }
 0x569   :  { %v613_v58 = vor.u32 1.1754944e-38, %v612_v54  ;;  %vm611_vm3 = vcmp.eq.f32.partialorder %v610_v56, 8.507059e+37 }
 0x56d   :  { %v1588_v45 = vpop.eup %1587 }
 0x56e   :  { %v602_v47 = vmul.f32 %v1588_v45, %v600_v44  ;;  %v1590_v52 = vpop.eup %1589  ;;  %vm607_vm15 = vweird.f32 %v1588_v45 }
 0x56f   :  { %v546_v55 = vadd.f32 1.0, %v1590_v52  ;;  %vm608_vm2 = vmor %vm606_vm0, %vm607_vm15 }
 0x570   :  { %v603_v50 = vsub.f32 1.0, %v602_v47 }
 0x571   :  { %1591 = vrcp.f32 %v546_v55  ;;  %v558_v3 = vand.u32 2147483648, %v546_v55  ;;  %vm552_vm5 = vweird.f32 %v546_v55  ;;  %v556_v4 = vand.u32 2147483647, %v546_v55 }
 0x572   :  { %v604_v51 = vmul.f32 %v1588_v45, %v603_v50 }
 0x573   :  { %v559_v14 = vor.u32 1.1754944e-38, %v558_v3  ;;  %vm557_vm7 = vcmp.eq.f32.partialorder %v556_v4, 8.507059e+37 }
 0x574   :  { %v605_v53 = vadd.f32 %v1588_v45, %v604_v51 }
 0x576   :  { %v609_v57 = vsel %vm608_vm2, %v1588_v45, %v605_v53 }
 0x577   :  { %v614_v59 = vsel %vm611_vm3, %v613_v58, %v609_v57  ;;  %v1592_v62 = vpop.eup %1591 }
 0x578   :  { %v548_v63 = vmul.f32 %v1592_v62, %v546_v55  ;;  %vm553_vm4 = vweird.f32 %v1592_v62  ;;  %v620_v8 = vmul.f32 %v618_v19, %v614_v59 }
 0x579   :  { %vm554_vm6 = vmor %vm552_vm5, %vm553_vm4 }
 0x57a   :  { %v549_v0 = vsub.f32 1.0, %v548_v63 }
 0x57c   :  { %v550_v1 = vmul.f32 %v1592_v62, %v549_v0 }
 0x57e   :  { %v551_v2 = vadd.f32 %v1592_v62, %v550_v1 }
 0x580   :  { %v555_v7 = vsel %vm554_vm6, %v1592_v62, %v551_v2 }
 0x581   :  { %v560_v16 = vsel %vm557_vm7, %v559_v14, %v555_v7 }
 0x582   :  { %v563_v23 = vmul.f32 %v560_v16, %v2059_v18 }
 0x5bc   :  { %v623_v60 = vpop.permute.xlu2 %622 }
 0x5bd   :  { %v625_v61 = vmul.f32 %v623_v60, %v614_v59 }
 0x5bf   :  { %627 = vrot.lane.b32.xlu1 %v625_v61, %s1865_s22 }
 0x5d6   :  { %v566_v15 = vpop.permute.xlu0 %565 }
 0x5d7   :  { %v568_v17 = vmul.f32 %v566_v15, %v560_v16 }
 0x5d9   :  { %570 = vrot.lane.b32.xlu2 %v568_v17, %s1865_s22 }
 0x631   :  { %v628_v20 = vpop.permute.xlu1 %627 }
 0x632   :  { %v2081_v21 = vadd.f32 %v628_v20, %v620_v8 }
 0x633   :  { %v571_v24 = vpop.permute.xlu2 %570 }
 0x634   :  { %1593 = vtanh.f32 %v2081_v21  ;;  %v2085_v25 = vadd.f32 %v571_v24, %v563_v23 }
 0x636   :  { %1595 = vtanh.f32 %v2085_v25 }
 0x63a   :  { %v1594_v27 = vpop.eup %1593 }
 0x63b   :  { %633 = vrot.lane.b32.xlu0 %v1594_v27, %s1868_s12 }
 0x63c   :  { %v1596_v28 = vpop.eup %1595 }
 0x63d   :  { %576 = vrot.lane.b32.xlu1 %v1596_v28, %s1868_s12 }
 0x6ad   :  { %v634_v9 = vpop.permute.xlu0 %633 }
 0x6ae   :  { %v636_v29 = vmul.f32 %v634_v9, %v614_v59 }
 0x6af   :  { %v577_v31 = vpop.permute.xlu1 %576 }
 0x6b0   :  { %v637_v30 = vpack.c.bf16 %v636_v29, %v636_v29  ;;  %v579_v32 = vmul.f32 %v577_v31, %v560_v16  ;;  %v754_v29 = vrot.slane %v2081_v21, 6 }
 0x6b2   :  { %v639_v33 = vrot.slane %v637_v30, 2  ;;  %v658_v18 = vpack.c.bf16 %v579_v32, %v579_v32 }
 0x6b4   :  { %640 = vrot.lane.b32.xlu2 %v639_v33, %s1865_s22  ;;  %660 = vrot.lane.b32.xlu0 %v658_v18, %s1865_s22 }
 0x70e   :  { %v641_v34 = vpop.permute.xlu2 %640 }
 0x70f   :  { %1495 = vmatmul.msk.bf16.vlgmr.msra.gmra.mxu0 %vm279_vm1, %v641_v34  ;;  %1498 = vmatmul.msk.bf16.vlgmr.msra.gmra.mxu2 %vm279_vm1, %v641_v34 }
 0x710   :  { %990 = vmatpush.bf16.msra.mxu0 %v1967_v5  ;;  %1075 = vmatpush.bf16.msra.mxu2 %v2010_v11 }
 0x714   :  { %991 = vmatpush.bf16.msra.mxu0 %v1969_v6  ;;  %1076 = vmatpush.bf16.msra.mxu2 %v2016_v13 }
 0x726   :  { %v661_v35 = vpop.permute.xlu0 %660 }
 0x727   :  { %1496 = vmatmul.msk.bf16.vlgmr.msra.gmra.mxu1 %vm279_vm1, %v661_v35 }
 0x728   :  { %1055 = vmatpush.bf16.msra.mxu1 %v2008_v10 }
 0x72c   :  { %1056 = vmatpush.bf16.msra.mxu1 %v2014_v12 }
 0x78c   :  { %v654_v36 = vpop.f32.mrf.mxu0 }
 0x78d   :  { %v655_v43 = vadd.f32 %v2046_v26, %v654_v36 }
 0x792   :  { %v725_v37 = vpop.f32.mrf.mxu2 }
 0x793   :  { %v730_v38 = vrot.slane %v725_v37, 2 }
 0x794   :  { %v656_v39 = vpop.f32.mrf.mxu0 }
 0x795   :  { %v732_v40 = vadd.f32 %v730_v38, %v1998_v48 }
 0x797   :  { %1597 = vtanh.f32 %v732_v40  ;;  %v1499_v51 = vmul.f32 -1.442695, %v732_v40 }
 0x79a   :  { %v727_v41 = vpop.f32.mrf.mxu2 }
 0x79d   :  { %v1598_v42 = vpop.eup %1597 }
 0x79e   :  { %758 = vrot.lane.b32.xlu1 %v1598_v42, %s1868_s12  ;;  %v2130_v42 = vadd.f32 %v1995_v46, %v2040_v22 }
 0x7a4   :  { %v674_v44 = vpop.f32.mrf.mxu1 }
 0x7a5   :  { %v678_v45 = vadd.f32 %v674_v44, %v655_v43 }
 0x7a7   :  { %1599 = vtanh.f32 %v678_v45  ;;  %v1497_v50 = vmul.f32 -1.442695, %v678_v45 }
 0x7a9   :  { %1601 = vpow2.f32 %v1497_v50 }
 0x7aa   :  { %1603 = vpow2.f32 %v1499_v51 }
 0x7ac   :  { %v676_v47 = vpop.f32.mrf.mxu1 }
 0x7ad   :  { %v1600_v49 = vpop.eup %1599 }
 0x7ae   :  { %701 = vrot.lane.b32.xlu2 %v1600_v49, %s1868_s12 }
 0x7af   :  { %v1602_v52 = vpop.eup %1601 }
 0x7b0   :  { %v682_v48 = vadd.f32 1.0, %v1602_v52  ;;  %v1604_v53 = vpop.eup %1603 }
 0x7b1   :  { %v736_v54 = vadd.f32 1.0, %v1604_v53 }
 0x7b2   :  { %1605 = vrcp.f32 %v682_v48  ;;  %v694_v63 = vand.u32 2147483648, %v682_v48  ;;  %vm688_vm9 = vweird.f32 %v682_v48  ;;  %v692_v0 = vand.u32 2147483647, %v682_v48 }
 0x7b3   :  { %1607 = vrcp.f32 %v736_v54  ;;  %v748_v16 = vand.u32 2147483648, %v736_v54  ;;  %vm742_vm13 = vweird.f32 %v736_v54  ;;  %v746_v17 = vand.u32 2147483647, %v736_v54 }
 0x7b4   :  { %v695_v3 = vor.u32 1.1754944e-38, %v694_v63  ;;  %vm693_vm11 = vcmp.eq.f32.partialorder %v692_v0, 8.507059e+37 }
 0x7b5   :  { %v749_v8 = vor.u32 1.1754944e-38, %v748_v16  ;;  %vm747_vm15 = vcmp.eq.f32.partialorder %v746_v17, 8.507059e+37 }
 0x7b8   :  { %v1606_v55 = vpop.eup %1605 }
 0x7b9   :  { %v684_v56 = vmul.f32 %v1606_v55, %v682_v48  ;;  %v1608_v57 = vpop.eup %1607  ;;  %vm689_vm8 = vweird.f32 %v1606_v55 }
 0x7ba   :  { %v738_v59 = vmul.f32 %v1608_v57, %v736_v54  ;;  %vm690_vm10 = vmor %vm688_vm9, %vm689_vm8  ;;  %vm743_vm12 = vweird.f32 %v1608_v57 }
 0x7bb   :  { %v685_v58 = vsub.f32 1.0, %v684_v56  ;;  %vm744_vm14 = vmor %vm742_vm13, %vm743_vm12 }
 0x7bc   :  { %v739_v61 = vsub.f32 1.0, %v738_v59 }
 0x7bd   :  { %v686_v60 = vmul.f32 %v1606_v55, %v685_v58 }
 0x7be   :  { %v740_v1 = vmul.f32 %v1608_v57, %v739_v61 }
 0x7bf   :  { %v687_v62 = vadd.f32 %v1606_v55, %v686_v60 }
 0x7c0   :  { %v741_v14 = vadd.f32 %v1608_v57, %v740_v1 }
 0x7c1   :  { %v691_v2 = vsel %vm690_vm10, %v1606_v55, %v687_v62 }
 0x7c2   :  { %v696_v7 = vsel %vm693_vm11, %v695_v3, %v691_v2  ;;  %v745_v19 = vsel %vm744_vm14, %v1608_v57, %v741_v14 }
 0x7c3   :  { %v750_v23 = vsel %vm747_vm15, %v749_v8, %v745_v19  ;;  %v699_v27 = vmul.f32 %v696_v7, %v2085_v25 }
 0x7c4   :  { %v756_v30 = vmul.f32 %v754_v29, %v750_v23 }
 0x808   :  { %v702_v4 = vpop.permute.xlu2 %701 }
 0x809   :  { %v704_v15 = vmul.f32 %v702_v4, %v696_v7 }
 0x80b   :  { %706 = vrot.lane.b32.xlu1 %v704_v15, %s1865_s22 }
 0x810   :  { %v759_v20 = vpop.permute.xlu1 %758 }
 0x811   :  { %v761_v24 = vmul.f32 %v759_v20, %v750_v23 }
 0x813   :  { %763 = vrot.lane.b32.xlu0 %v761_v24, %s1865_s22 }
 0x87d   :  { %v707_v28 = vpop.permute.xlu1 %706 }
 0x87e   :  { %v2108_v9 = vadd.f32 %v707_v28, %v699_v27 }
 0x880   :  { %1609 = vtanh.f32 %v2108_v9 }
 0x885   :  { %v764_v31 = vpop.permute.xlu0 %763 }
 0x886   :  { %v2112_v32 = vadd.f32 %v764_v31, %v756_v30  ;;  %v1610_v33 = vpop.eup %1609 }
 0x887   :  { %712 = vrot.lane.b32.xlu0 %v1610_v33, %s1868_s12 }
 0x888   :  { %1611 = vtanh.f32 %v2112_v32  ;;  %v887_v30 = vrot.slane %v2112_v32, 6 }
 0x88e   :  { %v1612_v18 = vpop.eup %1611 }
 0x88f   :  { %769 = vrot.lane.b32.xlu2 %v1612_v18, %s1868_s12 }
 0x8e9   :  { %v770_v25 = vpop.permute.xlu2 %769 }
 0x8ea   :  { %v772_v34 = vmul.f32 %v770_v25, %v750_v23 }
 0x8ec   :  { %v773_v35 = vpack.c.bf16 %v772_v34, %v772_v34 }
 0x8ee   :  { %v775_v36 = vrot.slane %v773_v35, 3 }
 0x8f0   :  { %776 = vrot.lane.b32.xlu1 %v775_v36, %s1865_s22 }
 0x8f9   :  { %v713_v37 = vpop.permute.xlu0 %712 }
 0x8fa   :  { %v715_v21 = vmul.f32 %v713_v37, %v696_v7 }
 0x8fc   :  { %v794_v38 = vpack.c.bf16 %v715_v21, %v715_v21 }
 0x8fe   :  { %796 = vrot.lane.b32.xlu2 %v794_v38, %s1865_s22 }
 0x958   :  { %v797_v39 = vpop.permute.xlu2 %796 }
 0x959   :  { %1501 = vmatmul.msk.bf16.vlgmr.msrb.gmra.mxu0 %vm279_vm1, %v797_v39 }
 0x95a   :  { %1191 = vmatpush.bf16.msrb.mxu0 %v2008_v10 }
 0x95e   :  { %1192 = vmatpush.bf16.msrb.mxu0 %v2014_v12 }
 0x962   :  { %v777_v40 = vpop.permute.xlu1 %776 }
 0x963   :  { %1500 = vmatmul.msk.bf16.vlgmr.msra.gmra.mxu3 %vm279_vm1, %v777_v40  ;;  %1503 = vmatmul.msk.bf16.vlgmr.msrb.gmra.mxu1 %vm279_vm1, %v777_v40 }
 0x964   :  { %1126 = vmatpush.bf16.msra.mxu3 %v1967_v5  ;;  %1211 = vmatpush.bf16.msrb.mxu1 %v2010_v11 }
 0x968   :  { %1127 = vmatpush.bf16.msra.mxu3 %v1969_v6  ;;  %1212 = vmatpush.bf16.msrb.mxu1 %v2016_v13 }
 0x9d6   :  { %v810_v41 = vpop.f32.mrf.mxu0 }
 0x9de   :  { %v812_v43 = vpop.f32.mrf.mxu0 }
 0x9e0   :  { %v861_v44 = vpop.f32.mrf.mxu1 }
 0x9e1   :  { %v865_v45 = vadd.f32 %v861_v44, %v2130_v42 }
 0x9e3   :  { %1613 = vtanh.f32 %v865_v45  ;;  %v1504_v46 = vmul.f32 -1.442695, %v865_v45 }
 0x9e6   :  { %v790_v47 = vpop.f32.mrf.mxu3 }
 0x9e7   :  { %v791_v49 = vadd.f32 %v2046_v26, %v790_v47 }
 0x9e8   :  { %v863_v50 = vpop.f32.mrf.mxu1 }
 0x9e9   :  { %v1614_v51 = vpop.eup %1613  ;;  %v814_v52 = vadd.f32 %v810_v41, %v791_v49 }
 0x9ea   :  { %891 = vrot.lane.b32.xlu0 %v1614_v51, %s1868_s12 }
 0x9eb   :  { %1615 = vtanh.f32 %v814_v52  ;;  %v1502_v22 = vmul.f32 -1.442695, %v814_v52 }
 0x9ec   :  { %1617 = vpow2.f32 %v1504_v46 }
 0x9ed   :  { %1619 = vpow2.f32 %v1502_v22 }
 0x9ee   :  { %v792_v48 = vpop.f32.mrf.mxu3 }
 0x9f1   :  { %v1616_v53 = vpop.eup %1615 }
 0x9f2   :  { %837 = vrot.lane.b32.xlu1 %v1616_v53, %s1868_s12  ;;  %v1618_v54 = vpop.eup %1617 }
 0x9f3   :  { %v869_v55 = vadd.f32 1.0, %v1618_v54  ;;  %v1620_v56 = vpop.eup %1619 }
 0x9f4   :  { %v818_v57 = vadd.f32 1.0, %v1620_v56 }
 0x9f5   :  { %1621 = vrcp.f32 %v869_v55  ;;  %v881_v2 = vand.u32 2147483648, %v869_v55  ;;  %vm875_vm2 = vweird.f32 %v869_v55  ;;  %v879_v3 = vand.u32 2147483647, %v869_v55 }
 0x9f6   :  { %1623 = vrcp.f32 %v818_v57  ;;  %v830_v8 = vand.u32 2147483648, %v818_v57  ;;  %vm824_vm6 = vweird.f32 %v818_v57  ;;  %v828_v20 = vand.u32 2147483647, %v818_v57 }
 0x9f7   :  { %v882_v14 = vor.u32 1.1754944e-38, %v881_v2  ;;  %vm880_vm4 = vcmp.eq.f32.partialorder %v879_v3, 8.507059e+37 }
 0x9f8   :  { %v831_v24 = vor.u32 1.1754944e-38, %v830_v8  ;;  %vm829_vm8 = vcmp.eq.f32.partialorder %v828_v20, 8.507059e+37 }
 0x9fb   :  { %v1622_v58 = vpop.eup %1621 }
 0x9fc   :  { %v871_v59 = vmul.f32 %v1622_v58, %v869_v55  ;;  %v1624_v61 = vpop.eup %1623  ;;  %vm876_vm0 = vweird.f32 %v1622_v58 }
 0x9fd   :  { %v820_v63 = vmul.f32 %v1624_v61, %v818_v57  ;;  %vm877_vm3 = vmor %vm875_vm2, %vm876_vm0  ;;  %vm825_vm5 = vweird.f32 %v1624_v61 }
 0x9fe   :  { %v872_v60 = vsub.f32 1.0, %v871_v59  ;;  %vm826_vm7 = vmor %vm824_vm6, %vm825_vm5 }
 0x9ff   :  { %v821_v1 = vsub.f32 1.0, %v820_v63 }
 0xa00   :  { %v873_v62 = vmul.f32 %v1622_v58, %v872_v60 }
 0xa01   :  { %v822_v7 = vmul.f32 %v1624_v61, %v821_v1 }
 0xa02   :  { %v874_v0 = vadd.f32 %v1622_v58, %v873_v62 }
 0xa03   :  { %v823_v19 = vadd.f32 %v1624_v61, %v822_v7 }
 0xa04   :  { %v878_v4 = vsel %vm877_vm3, %v1622_v58, %v874_v0 }
 0xa05   :  { %v883_v15 = vsel %vm880_vm4, %v882_v14, %v878_v4  ;;  %v827_v23 = vsel %vm826_vm7, %v1624_v61, %v823_v19 }
 0xa06   :  { %v832_v28 = vsel %vm829_vm8, %v831_v24, %v827_v23  ;;  %v889_v31 = vmul.f32 %v887_v30, %v883_v15 }
 0xa07   :  { %v835_v34 = vmul.f32 %v832_v28, %v2108_v9 }
 0xa5c   :  { %v892_v16 = vpop.permute.xlu0 %891 }
 0xa5d   :  { %v894_v17 = vmul.f32 %v892_v16, %v883_v15 }
 0xa5f   :  { %896 = vrot.lane.b32.xlu2 %v894_v17, %s1865_s22 }
 0xa64   :  { %v838_v27 = vpop.permute.xlu1 %837 }
 0xa65   :  { %v840_v29 = vmul.f32 %v838_v27, %v832_v28 }
 0xa67   :  { %842 = vrot.lane.b32.xlu0 %v840_v29, %s1865_s22 }
 0xab9   :  { %v897_v33 = vpop.permute.xlu2 %896 }
 0xaba   :  { %v2139_v18 = vadd.f32 %v897_v33, %v889_v31 }
 0xabc   :  { %1625 = vtanh.f32 %v2139_v18  ;;  %v1022_v27 = vrot.slane %v2139_v18, 6 }
 0xac2   :  { %v1626_v25 = vpop.eup %1625 }
 0xac3   :  { %902 = vrot.lane.b32.xlu1 %v1626_v25, %s1868_s12 }
 0xad9   :  { %v843_v35 = vpop.permute.xlu0 %842 }
 0xada   :  { %v2144_v36 = vadd.f32 %v843_v35, %v835_v34 }
 0xadc   :  { %1627 = vtanh.f32 %v2144_v36 }
 0xae2   :  { %v1628_v37 = vpop.eup %1627 }
 0xae3   :  { %848 = vrot.lane.b32.xlu2 %v1628_v37, %s1868_s12 }
 0xb35   :  { %v903_v32 = vpop.permute.xlu1 %902 }
 0xb36   :  { %v905_v21 = vmul.f32 %v903_v32, %v883_v15 }
 0xb38   :  { %v906_v38 = vpack.c.bf16 %v905_v21, %v905_v21 }
 0xb3a   :  { %908 = vrot.lane.b32.xlu0 %v906_v38, %s1865_s22 }
 0xb3d   :  { %v849_v39 = vpop.permute.xlu2 %848 }
 0xb3e   :  { %v851_v40 = vmul.f32 %v849_v39, %v832_v28 }
 0xb40   :  { %v926_v41 = vpack.c.bf16 %v851_v40, %v851_v40 }
 0xb42   :  { %928 = vrot.lane.b32.xlu1 %v926_v41, %s1865_s22 }
 0xbac   :  { %v909_v43 = vpop.permute.xlu0 %908 }
 0xbad   :  { %1505 = vmatmul.msk.bf16.vlgmr.msrb.gmra.mxu2 %vm279_vm1, %v909_v43  ;;  %1508 = vmatmul.msk.bf16.vlgmr.msra.gmra.mxu0 %vm279_vm1, %v909_v43 }
 0xbae   :  { %1262 = vmatpush.bf16.msrb.mxu2 %v1967_v5  ;;  %1347 = vmatpush.bf16.msra.mxu0 %v2010_v11 }
 0xbb2   :  { %1263 = vmatpush.bf16.msrb.mxu2 %v1969_v6  ;;  %1348 = vmatpush.bf16.msra.mxu0 %v2016_v13 }
 0xbb4   :  { %v929_v9 = vpop.permute.xlu1 %928 }
 0xbb5   :  { %1506 = vmatmul.msk.bf16.vlgmr.msrb.gmra.mxu3 %vm279_vm1, %v929_v9 }
 0xbb6   :  { %1327 = vmatpush.bf16.msrb.mxu3 %v2008_v10 }
 0xbba   :  { %1328 = vmatpush.bf16.msrb.mxu3 %v2014_v12 }
 0xc2a   :  { %v993_v44 = vpop.f32.mrf.mxu0 }
 0xc2b   :  { %v998_v45 = vrot.slane %v993_v44, 6 }
 0xc2d   :  { %v1000_v47 = vadd.f32 %v998_v45, %v2130_v42 }
 0xc2f   :  { %1629 = vtanh.f32 %v1000_v47  ;;  %v1509_v12 = vmul.f32 -1.442695, %v1000_v47 }
 0xc30   :  { %v922_v49 = vpop.f32.mrf.mxu2 }
 0xc31   :  { %v923_v6 = vadd.f32 %v2046_v26, %v922_v49 }
 0xc32   :  { %v995_v5 = vpop.f32.mrf.mxu0 }
 0xc35   :  { %v1630_v50 = vpop.eup %1629 }
 0xc36   :  { %1026 = vrot.lane.b32.xlu2 %v1630_v50, %s1868_s12 }
 0xc38   :  { %v924_v11 = vpop.f32.mrf.mxu2  ;;  %v942_v13 = vpop.f32.mrf.mxu3 }
 0xc39   :  { %v946_v51 = vadd.f32 %v942_v13, %v923_v6 }
 0xc3b   :  { %1631 = vtanh.f32 %v946_v51  ;;  %v1507_v56 = vmul.f32 -1.442695, %v946_v51 }
 0xc3c   :  { %1633 = vpow2.f32 %v1509_v12 }
 0xc40   :  { %v944_v52 = vpop.f32.mrf.mxu3 }
 0xc41   :  { %v1632_v10 = vpop.eup %1631 }
 0xc42   :  { %969 = vrot.lane.b32.xlu0 %v1632_v10, %s1868_s12  ;;  %v1634_v48 = vpop.eup %1633 }
 0xc43   :  { %v1004_v53 = vadd.f32 1.0, %v1634_v48 }
 0xc45   :  { %1635 = vrcp.f32 %v1004_v53  ;;  %v1016_v58 = vand.u32 2147483648, %v1004_v53  ;;  %vm1010_vm10 = vweird.f32 %v1004_v53  ;;  %v1014_v59 = vand.u32 2147483647, %v1004_v53 }
 0xc46   :  { %1637 = vpow2.f32 %v1507_v56 }
 0xc47   :  { %v1017_v61 = vor.u32 1.1754944e-38, %v1016_v58  ;;  %vm1015_vm12 = vcmp.eq.f32.partialorder %v1014_v59, 8.507059e+37 }
 0xc4b   :  { %v1636_v46 = vpop.eup %1635 }
 0xc4c   :  { %v1006_v22 = vmul.f32 %v1636_v46, %v1004_v53  ;;  %vm1011_vm9 = vweird.f32 %v1636_v46  ;;  %v1638_v0 = vpop.eup %1637 }
 0xc4d   :  { %vm1012_vm11 = vmor %vm1010_vm10, %vm1011_vm9  ;;  %v950_v2 = vadd.f32 1.0, %v1638_v0 }
 0xc4e   :  { %v1007_v54 = vsub.f32 1.0, %v1006_v22 }
 0xc4f   :  { %1639 = vrcp.f32 %v950_v2  ;;  %v962_v16 = vand.u32 2147483648, %v950_v2  ;;  %vm956_vm14 = vweird.f32 %v950_v2  ;;  %v960_v17 = vand.u32 2147483647, %v950_v2 }
 0xc50   :  { %v1008_v55 = vmul.f32 %v1636_v46, %v1007_v54 }
 0xc51   :  { %v963_v8 = vor.u32 1.1754944e-38, %v962_v16  ;;  %vm961_vm0 = vcmp.eq.f32.partialorder %v960_v17, 8.507059e+37 }
 0xc52   :  { %v1009_v57 = vadd.f32 %v1636_v46, %v1008_v55 }
 0xc54   :  { %v1013_v60 = vsel %vm1012_vm11, %v1636_v46, %v1009_v57 }
 0xc55   :  { %v1018_v63 = vsel %vm1015_vm12, %v1017_v61, %v1013_v60  ;;  %v1640_v3 = vpop.eup %1639 }
 0xc56   :  { %v952_v4 = vmul.f32 %v1640_v3, %v950_v2  ;;  %vm957_vm13 = vweird.f32 %v1640_v3  ;;  %v1024_v28 = vmul.f32 %v1022_v27, %v1018_v63 }
 0xc57   :  { %vm958_vm15 = vmor %vm956_vm14, %vm957_vm13 }
 0xc58   :  { %v953_v7 = vsub.f32 1.0, %v952_v4 }
 0xc5a   :  { %v954_v14 = vmul.f32 %v1640_v3, %v953_v7 }
 0xc5c   :  { %v955_v15 = vadd.f32 %v1640_v3, %v954_v14 }
 0xc5e   :  { %v959_v19 = vsel %vm958_vm15, %v1640_v3, %v955_v15 }
 0xc5f   :  { %v964_v23 = vsel %vm961_vm0, %v963_v8, %v959_v19 }
 0xc60   :  { %v967_v33 = vmul.f32 %v964_v23, %v2144_v36 }
 0xc90   :  { %v1027_v62 = vpop.permute.xlu2 %1026 }
 0xc91   :  { %v1029_v1 = vmul.f32 %v1027_v62, %v1018_v63 }
 0xc93   :  { %1031 = vrot.lane.b32.xlu1 %v1029_v1, %s1865_s22 }
 0xcb4   :  { %v970_v20 = vpop.permute.xlu0 %969 }
 0xcb5   :  { %v972_v24 = vmul.f32 %v970_v20, %v964_v23 }
 0xcb7   :  { %974 = vrot.lane.b32.xlu2 %v972_v24, %s1865_s22 }
 0xd05   :  { %v1032_v29 = vpop.permute.xlu1 %1031 }
 0xd06   :  { %v2166_v30 = vadd.f32 %v1032_v29, %v1024_v28 }
 0xd08   :  { %1641 = vtanh.f32 %v2166_v30  ;;  %v1158_v20 = vrot.slane %v2166_v30, 6 }
 0xd0e   :  { %v1642_v31 = vpop.eup %1641 }
 0xd0f   :  { %1037 = vrot.lane.b32.xlu0 %v1642_v31, %s1868_s12 }
 0xd11   :  { %v975_v25 = vpop.permute.xlu2 %974 }
 0xd12   :  { %v2171_v34 = vadd.f32 %v975_v25, %v967_v33 }
 0xd14   :  { %1643 = vtanh.f32 %v2171_v34 }
 0xd1a   :  { %v1644_v35 = vpop.eup %1643 }
 0xd1b   :  { %980 = vrot.lane.b32.xlu1 %v1644_v35, %s1868_s12 }
 0xd81   :  { %v1038_v18 = vpop.permute.xlu0 %1037 }
 0xd82   :  { %v1040_v37 = vmul.f32 %v1038_v18, %v1018_v63 }
 0xd84   :  { %v1041_v32 = vpack.c.bf16 %v1040_v37, %v1040_v37 }
 0xd86   :  { %v1043_v21 = vrot.slane %v1041_v32, 1 }
 0xd88   :  { %1044 = vrot.lane.b32.xlu2 %v1043_v21, %s1865_s22 }
 0xd8d   :  { %v981_v38 = vpop.permute.xlu1 %980 }
 0xd8e   :  { %v983_v39 = vmul.f32 %v981_v38, %v964_v23 }
 0xd90   :  { %v1062_v40 = vpack.c.bf16 %v983_v39, %v983_v39 }
 0xd92   :  { %1064 = vrot.lane.b32.xlu0 %v1062_v40, %s1865_s22 }
 0xde2   :  { %v1045_v36 = vpop.permute.xlu2 %1044 }
 0xde3   :  { %1510 = vmatmul.msk.bf16.vlgmr.msra.gmra.mxu1 %vm279_vm1, %v1045_v36  ;;  %1513 = vmatmul.msk.bf16.vlgmr.msra.gmra.mxu3 %vm279_vm1, %v1045_v36  ;;  %v2204_v36 = vld [vmem:[%s2246_s8] ss:$0 sm:$0xff] }
 0xe04   :  { %v1065_v41 = vpop.permute.xlu0 %1064 }
 0xe05   :  { %1511 = vmatmul.msk.bf16.vlgmr.msra.gmra.mxu2 %vm279_vm1, %v1065_v41 }
 0xe60   :  { %v1058_v43 = vpop.f32.mrf.mxu1 }
 0xe61   :  { %v1059_v50 = vadd.f32 %v2046_v26, %v1058_v43 }
 0xe66   :  { %v1129_v9 = vpop.f32.mrf.mxu3 }
 0xe67   :  { %v1134_v44 = vrot.slane %v1129_v9, 4 }
 0xe68   :  { %v1060_v45 = vpop.f32.mrf.mxu1 }
 0xe69   :  { %v1136_v47 = vadd.f32 %v1134_v44, %v2130_v42 }
 0xe6b   :  { %1645 = vtanh.f32 %v1136_v47  ;;  %v1514_v52 = vmul.f32 -1.442695, %v1136_v47 }
 0xe6e   :  { %v1131_v49 = vpop.f32.mrf.mxu3 }
 0xe71   :  { %v1646_v5 = vpop.eup %1645 }
 0xe72   :  { %1162 = vrot.lane.b32.xlu1 %v1646_v5, %s1868_s12 }
 0xe88   :  { %v1078_v6 = vpop.f32.mrf.mxu2 }
 0xe89   :  { %v1082_v11 = vadd.f32 %v1078_v6, %v1059_v50 }
 0xe8b   :  { %1647 = vtanh.f32 %v1082_v11  ;;  %v1512_v10 = vmul.f32 -1.442695, %v1082_v11 }
 0xe8c   :  { %1649 = vpow2.f32 %v1514_v52 }
 0xe8d   :  { %1651 = vpow2.f32 %v1512_v10 }
 0xe90   :  { %v1080_v13 = vpop.f32.mrf.mxu2 }
 0xe91   :  { %v1648_v51 = vpop.eup %1647 }
 0xe92   :  { %1105 = vrot.lane.b32.xlu2 %v1648_v51, %s1868_s12  ;;  %v1650_v12 = vpop.eup %1649 }
 0xe93   :  { %v1140_v48 = vadd.f32 1.0, %v1650_v12  ;;  %v1652_v53 = vpop.eup %1651 }
 0xe94   :  { %v1086_v46 = vadd.f32 1.0, %v1652_v53 }
 0xe95   :  { %1653 = vrcp.f32 %v1140_v48  ;;  %v1152_v60 = vand.u32 2147483648, %v1140_v48  ;;  %vm1146_vm3 = vweird.f32 %v1140_v48  ;;  %v1150_v61 = vand.u32 2147483647, %v1140_v48 }
 0xe96   :  { %1655 = vrcp.f32 %v1086_v46  ;;  %v1098_v7 = vand.u32 2147483648, %v1086_v46  ;;  %vm1092_vm7 = vweird.f32 %v1086_v46  ;;  %v1096_v14 = vand.u32 2147483647, %v1086_v46 }
 0xe97   :  { %v1153_v0 = vor.u32 1.1754944e-38, %v1152_v60  ;;  %vm1151_vm5 = vcmp.eq.f32.partialorder %v1150_v61, 8.507059e+37 }
 0xe98   :  { %v1099_v16 = vor.u32 1.1754944e-38, %v1098_v7  ;;  %vm1097_vm9 = vcmp.eq.f32.partialorder %v1096_v14, 8.507059e+37 }
 0xe9b   :  { %v1654_v22 = vpop.eup %1653 }
 0xe9c   :  { %v1142_v54 = vmul.f32 %v1654_v22, %v1140_v48  ;;  %v1656_v55 = vpop.eup %1655  ;;  %vm1147_vm2 = vweird.f32 %v1654_v22 }
 0xe9d   :  { %v1088_v57 = vmul.f32 %v1656_v55, %v1086_v46  ;;  %vm1148_vm4 = vmor %vm1146_vm3, %vm1147_vm2  ;;  %vm1093_vm6 = vweird.f32 %v1656_v55 }
 0xe9e   :  { %v1143_v26 = vsub.f32 1.0, %v1142_v54  ;;  %vm1094_vm8 = vmor %vm1092_vm7, %vm1093_vm6  ;;  %vm1432_vm7 = vcmask 25600  }
 0xe9f   :  { %v1089_v59 = vsub.f32 1.0, %v1088_v57 }
 0xea0   :  { %v1144_v56 = vmul.f32 %v1654_v22, %v1143_v26 }
 0xea1   :  { %v1090_v63 = vmul.f32 %v1656_v55, %v1089_v59 }
 0xea2   :  { %v1145_v58 = vadd.f32 %v1654_v22, %v1144_v56 }
 0xea3   :  { %v1091_v4 = vadd.f32 %v1656_v55, %v1090_v63 }
 0xea4   :  { %v1149_v62 = vsel %vm1148_vm4, %v1654_v22, %v1145_v58 }
 0xea5   :  { %v1154_v1 = vsel %vm1151_vm5, %v1153_v0, %v1149_v62  ;;  %v1095_v15 = vsel %vm1094_vm8, %v1656_v55, %v1091_v4 }
 0xea6   :  { %v1100_v19 = vsel %vm1097_vm9, %v1099_v16, %v1095_v15  ;;  %v1160_v23 = vmul.f32 %v1158_v20, %v1154_v1 }
 0xea7   :  { %v1103_v28 = vmul.f32 %v1100_v19, %v2171_v34 }
 0xee4   :  { %v1163_v2 = vpop.permute.xlu1 %1162 }
 0xee5   :  { %v1165_v3 = vmul.f32 %v1163_v2, %v1154_v1 }
 0xee7   :  { %1167 = vrot.lane.b32.xlu0 %v1165_v3, %s1865_s22 }
 0xeec   :  { %v1106_v17 = vpop.permute.xlu2 %1105 }
 0xeed   :  { %v1108_v8 = vmul.f32 %v1106_v17, %v1100_v19 }
 0xeef   :  { %1110 = vrot.lane.b32.xlu1 %v1108_v8, %s1865_s22 }
 0xf59   :  { %v1168_v24 = vpop.permute.xlu0 %1167 }
 0xf5a   :  { %v2187_v27 = vadd.f32 %v1168_v24, %v1160_v23 }
 0xf5c   :  { %1657 = vtanh.f32 %v2187_v27  ;;  %v1294_v17 = vrot.slane %v2187_v27, 6 }
 0xf61   :  { %v1111_v29 = vpop.permute.xlu1 %1110 }
 0xf62   :  { %v1658_v31 = vpop.eup %1657  ;;  %v2191_v33 = vadd.f32 %v1111_v29, %v1103_v28 }
 0xf63   :  { %1173 = vrot.lane.b32.xlu2 %v1658_v31, %s1868_s12 }
 0xf64   :  { %1659 = vtanh.f32 %v2191_v33 }
 0xf6a   :  { %v1660_v25 = vpop.eup %1659 }
 0xf6b   :  { %1116 = vrot.lane.b32.xlu0 %v1660_v25, %s1868_s12 }
 0xfbd   :  { %v1174_v30 = vpop.permute.xlu2 %1173 }
 0xfbe   :  { %v1176_v35 = vmul.f32 %v1174_v30, %v1154_v1 }
 0xfc0   :  { %v1177_v18 = vpack.c.bf16 %v1176_v35, %v1176_v35 }
 0xfc2   :  { %v1179_v37 = vrot.slane %v1177_v18, 2 }
 0xfc4   :  { %1180 = vrot.lane.b32.xlu1 %v1179_v37, %s1865_s22 }
 0xfdd   :  { %v1117_v32 = vpop.permute.xlu0 %1116 }
 0xfde   :  { %v1119_v21 = vmul.f32 %v1117_v32, %v1100_v19 }
 0xfe0   :  { %v1198_v34 = vpack.c.bf16 %v1119_v21, %v1119_v21 }
 0xfe2   :  { %1200 = vrot.lane.b32.xlu2 %v1198_v34, %s1865_s22 }
0x1036   :  { %v1181_v38 = vpop.permute.xlu1 %1180 }
0x1037   :  { %1515 = vmatmul.msk.bf16.vlgmr.msrb.gmra.mxu0 %vm279_vm1, %v1181_v38  ;;  %1518 = vmatmul.msk.bf16.vlgmr.msrb.gmra.mxu2 %vm279_vm1, %v1181_v38 }
0x103c   :  { %v1201_v39 = vpop.permute.xlu2 %1200 }
0x103d   :  { %1516 = vmatmul.msk.bf16.vlgmr.msrb.gmra.mxu1 %vm279_vm1, %v1201_v39 }
0x10b4   :  { %v1194_v40 = vpop.f32.mrf.mxu0 }
0x10b5   :  { %v1195_v41 = vadd.f32 %v2204_v36, %v1194_v40 }
0x10ba   :  { %v1214_v43 = vpop.f32.mrf.mxu1  ;;  %v1265_v9 = vpop.f32.mrf.mxu2 }
0x10bb   :  { %v1218_v44 = vadd.f32 %v1214_v43, %v1195_v41  ;;  %v1270_v45 = vrot.slane %v1265_v9, 2 }
0x10bc   :  { %v1196_v47 = vpop.f32.mrf.mxu0 }
0x10bd   :  { %1661 = vtanh.f32 %v1218_v44  ;;  %v1272_v49 = vadd.f32 %v1270_v45, %v2130_v42  ;;  %v1517_v13 = vmul.f32 -1.442695, %v1218_v44 }
0x10bf   :  { %1663 = vtanh.f32 %v1272_v49  ;;  %v1519_v51 = vmul.f32 -1.442695, %v1272_v49 }
0x10c0   :  { %1665 = vpow2.f32 %v1517_v13 }
0x10c1   :  { %1667 = vpow2.f32 %v1519_v51 }
0x10c2   :  { %v1216_v5 = vpop.f32.mrf.mxu1  ;;  %v1267_v50 = vpop.f32.mrf.mxu2 }
0x10c3   :  { %v1662_v6 = vpop.eup %1661 }
0x10c4   :  { %1241 = vrot.lane.b32.xlu1 %v1662_v6, %s1868_s12 }
0x10c5   :  { %v1664_v11 = vpop.eup %1663 }
0x10c6   :  { %1298 = vrot.lane.b32.xlu0 %v1664_v11, %s1868_s12  ;;  %v1666_v52 = vpop.eup %1665 }
0x10c7   :  { %v1668_v10 = vpop.eup %1667  ;;  %v1222_v12 = vadd.f32 1.0, %v1666_v52 }
0x10c8   :  { %v1276_v48 = vadd.f32 1.0, %v1668_v10 }
0x10c9   :  { %1669 = vrcp.f32 %v1222_v12  ;;  %v1234_v58 = vand.u32 2147483648, %v1222_v12  ;;  %vm1228_vm11 = vweird.f32 %v1222_v12  ;;  %v1232_v59 = vand.u32 2147483647, %v1222_v12 }
0x10ca   :  { %1671 = vrcp.f32 %v1276_v48  ;;  %v1288_v62 = vand.u32 2147483648, %v1276_v48  ;;  %vm1282_vm14 = vweird.f32 %v1276_v48  ;;  %v1286_v0 = vand.u32 2147483647, %v1276_v48 }
0x10cb   :  { %v1235_v63 = vor.u32 1.1754944e-38, %v1234_v58  ;;  %vm1233_vm15 = vcmp.eq.f32.partialorder %v1232_v59, 8.507059e+37  ;;  %v1556_v59 = vld [vmem:[%s2248_s10] ss:$0 sm:$0xff] }
0x10cc   :  { %v1289_v7 = vor.u32 1.1754944e-38, %v1288_v62  ;;  %vm1287_vm2 = vcmp.eq.f32.partialorder %v1286_v0, 8.507059e+37 }
0x10cf   :  { %v1670_v42 = vpop.eup %1669 }
0x10d0   :  { %v1672_v53 = vpop.eup %1671  ;;  %v1224_v46 = vmul.f32 %v1670_v42, %v1222_v12  ;;  %vm1229_vm10 = vweird.f32 %v1670_v42 }
0x10d1   :  { %v1278_v22 = vmul.f32 %v1672_v53, %v1276_v48  ;;  %vm1230_vm12 = vmor %vm1228_vm11, %vm1229_vm10  ;;  %vm1283_vm13 = vweird.f32 %v1672_v53 }
0x10d2   :  { %v1225_v54 = vsub.f32 1.0, %v1224_v46  ;;  %vm1284_vm0 = vmor %vm1282_vm14, %vm1283_vm13 }
0x10d3   :  { %v1279_v26 = vsub.f32 1.0, %v1278_v22 }
0x10d4   :  { %v1226_v55 = vmul.f32 %v1670_v42, %v1225_v54  ;;  %v1540_v54 = vld [vmem:[%s2247_s9 + $0x8] sm:$0xff] }
0x10d5   :  { %v1280_v56 = vmul.f32 %v1672_v53, %v1279_v26  ;;  %1425 = vmatpush.bf16.msra.mxu1 %v1540_v54  ;;  %v1539_v26 = vld [vmem:[%s2247_s9] sm:$0xff] }
0x10d6   :  { %v1227_v57 = vadd.f32 %v1670_v42, %v1226_v55 }
0x10d7   :  { %v1281_v60 = vadd.f32 %v1672_v53, %v1280_v56 }
0x10d8   :  { %v1231_v61 = vsel %vm1230_vm12, %v1670_v42, %v1227_v57 }
0x10d9   :  { %v1236_v2 = vsel %vm1233_vm15, %v1235_v63, %v1231_v61  ;;  %v1285_v3 = vsel %vm1284_vm0, %v1672_v53, %v1281_v60  ;;  %1426 = vmatpush.bf16.msra.mxu1 %v1539_v26 }
0x10da   :  { %v1290_v15 = vsel %vm1287_vm2, %v1289_v7, %v1285_v3  ;;  %v1239_v24 = vmul.f32 %v1236_v2, %v2191_v33 }
0x10db   :  { %v1296_v19 = vmul.f32 %v1294_v17, %v1290_v15 }
0x1136   :  { %v1242_v1 = vpop.permute.xlu1 %1241 }
0x1137   :  { %v1244_v4 = vmul.f32 %v1242_v1, %v1236_v2 }
0x1138   :  { %v1299_v14 = vpop.permute.xlu0 %1298 }
0x1139   :  { %1246 = vrot.lane.b32.xlu0 %v1244_v4, %s1865_s22  ;;  %v1301_v16 = vmul.f32 %v1299_v14, %v1290_v15 }
0x113b   :  { %1303 = vrot.lane.b32.xlu2 %v1301_v16, %s1865_s22 }
0x1195   :  { %v1304_v8 = vpop.permute.xlu2 %1303 }
0x1196   :  { %v1306_v20 = vadd.f32 %v1304_v8, %v1296_v19 }
0x1198   :  { %1673 = vtanh.f32 %v1306_v20 }
0x119e   :  { %v1674_v23 = vpop.eup %1673 }
0x119f   :  { %1309 = vrot.lane.b32.xlu1 %v1674_v23, %s1868_s12 }
0x11ab   :  { %v1247_v28 = vpop.permute.xlu0 %1246 }
0x11ac   :  { %v1249_v29 = vadd.f32 %v1247_v28, %v1239_v24 }
0x11ae   :  { %1675 = vtanh.f32 %v1249_v29 }
0x11b4   :  { %v1676_v31 = vpop.eup %1675 }
0x11b5   :  { %1252 = vrot.lane.b32.xlu2 %v1676_v31, %s1868_s12 }
0x120f   :  { %v1253_v25 = vpop.permute.xlu2 %1252 }
0x1210   :  { %v1255_v30 = vmul.f32 %v1253_v25, %v1236_v2 }
0x1211   :  { %v1310_v18 = vpop.permute.xlu1 %1309 }
0x1212   :  { %v1334_v35 = vpack.c.bf16 %v1255_v30, %v1255_v30  ;;  %v1312_v27 = vmul.f32 %v1310_v18, %v1290_v15 }
0x1214   :  { %1336 = vrot.lane.b32.xlu1 %v1334_v35, %s1865_s22  ;;  %v1313_v37 = vpack.c.bf16 %v1312_v27, %v1312_v27 }
0x1216   :  { %v1315_v32 = vrot.slane %v1313_v37, 3 }
0x1218   :  { %1316 = vrot.lane.b32.xlu0 %v1315_v32, %s1865_s22 }
0x1286   :  { %v1337_v21 = vpop.permute.xlu1 %1336 }
0x1287   :  { %1521 = vmatmul.msk.bf16.vlgmr.msra.gmra.mxu0 %vm279_vm1, %v1337_v21 }
0x128a   :  { %v1317_v33 = vpop.permute.xlu0 %1316 }
0x128b   :  { %1520 = vmatmul.msk.bf16.vlgmr.msrb.gmra.mxu3 %vm279_vm1, %v1317_v33 }
0x1304   :  { %v1350_v34 = vpop.f32.mrf.mxu0 }
0x130c   :  { %v1352_v38 = vpop.f32.mrf.mxu0 }
0x130e   :  { %v1330_v39 = vpop.f32.mrf.mxu3 }
0x130f   :  { %v1331_v40 = vadd.f32 %v2204_v36, %v1330_v39 }
0x1311   :  { %v1354_v41 = vadd.f32 %v1350_v34, %v1331_v40 }
0x1313   :  { %1677 = vtanh.f32 %v1354_v41  ;;  %v1522_v44 = vmul.f32 -1.442695, %v1354_v41 }
0x1315   :  { %1679 = vpow2.f32 %v1522_v44 }
0x1316   :  { %v1332_v43 = vpop.f32.mrf.mxu3 }
0x1319   :  { %v1678_v9 = vpop.eup %1677 }
0x131a   :  { %1377 = vrot.lane.b32.xlu2 %v1678_v9, %s1868_s12 }
0x131b   :  { %v1680_v45 = vpop.eup %1679 }
0x131c   :  { %v1358_v47 = vadd.f32 1.0, %v1680_v45 }
0x131e   :  { %1681 = vrcp.f32 %v1358_v47  ;;  %v1370_v13 = vand.u32 2147483648, %v1358_v47  ;;  %vm1364_vm4 = vweird.f32 %v1358_v47  ;;  %v1368_v36 = vand.u32 2147483647, %v1358_v47 }
0x1320   :  { %v1371_v52 = vor.u32 1.1754944e-38, %v1370_v13  ;;  %vm1369_vm6 = vcmp.eq.f32.partialorder %v1368_v36, 8.507059e+37 }
0x1324   :  { %v1682_v49 = vpop.eup %1681 }
0x1325   :  { %v1360_v5 = vmul.f32 %v1682_v49, %v1358_v47  ;;  %vm1365_vm3 = vweird.f32 %v1682_v49 }
0x1326   :  { %vm1366_vm5 = vmor %vm1364_vm4, %vm1365_vm3 }
0x1327   :  { %v1361_v50 = vsub.f32 1.0, %v1360_v5 }
0x1329   :  { %v1362_v6 = vmul.f32 %v1682_v49, %v1361_v50 }
0x132b   :  { %v1363_v11 = vadd.f32 %v1682_v49, %v1362_v6 }
0x132d   :  { %v1367_v51 = vsel %vm1366_vm5, %v1682_v49, %v1363_v11 }
0x132e   :  { %v1372_v12 = vsel %vm1369_vm6, %v1371_v52, %v1367_v51 }
0x132f   :  { %v1375_v42 = vmul.f32 %v1372_v12, %v1249_v29 }
0x1374   :  { %v1378_v10 = vpop.permute.xlu2 %1377 }
0x1375   :  { %v1380_v48 = vmul.f32 %v1378_v10, %v1372_v12 }
0x1377   :  { %1382 = vrot.lane.b32.xlu0 %v1380_v48, %s1865_s22 }
0x13e9   :  { %v1383_v53 = vpop.permute.xlu0 %1382 }
0x13ea   :  { %v1385_v46 = vadd.f32 %v1383_v53, %v1375_v42 }
0x13ec   :  { %1683 = vtanh.f32 %v1385_v46 }
0x13f2   :  { %v1684_v22 = vpop.eup %1683 }
0x13f3   :  { %1388 = vrot.lane.b32.xlu1 %v1684_v22, %s1868_s12 }
0x1465   :  { %v1389_v55 = vpop.permute.xlu1 %1388 }
0x1466   :  { %v1391_v56 = vmul.f32 %v1389_v55, %v1372_v12 }
0x1468   :  { %v1392_v57 = vpack.c.bf16 %v1391_v56, %v1391_v56 }
0x146a   :  { %1402 = vrot.lane.b32.xlu2 %v1392_v57, %s1865_s22 }
0x14c4   :  { %v1403_v58 = vpop.permute.xlu2 %1402 }
0x14c5   :  { %1531 = vmatmul.msk.bf16.vlgmr.msra.gmra.mxu1 %vm279_vm1, %v1403_v58 }
0x1542   :  { %v1428_v60 = vpop.f32.mrf.mxu1 }
0x1543   :  { %v1429_v61 = vadd.f32 %v1556_v59, %v1428_v60 }
0x1545   :  { %1433 = vst.msk [vmem:[#allocation13] sm:$0x3] %vm1432_vm7, %v1429_v61 }
0x1546   :  { %1444 = dma.vmem_to_hbm [thread:$0]  %s1440_s19, 32, %s1442_s24, [#allocation4]  }
0x154a   :  { %v1430_v62 = vpop.f32.mrf.mxu1 }
0x154b   :  { %1862 = dma.done.wait [#allocation4], 32  }
0x154c   :  { %1863 = vsyncadd [#allocation4], 4294967264 }
0x154d   :  { %1449 = vsyncpa [#allocation3], 1 }
0x154e   :  { %1450 = vsyncpa [#allocation6], 1 }
0x154f   :  { %1451 = vsyncpa [#allocation9], 1 }
0x1550   :  { %1452 = vsyncpa [#allocation12], 1 }
0x1551   :  { %1453 = vsyncpa [#allocation4], 1 }

</bundles_post_ra>
